<compile_context>
chip_gen: v7x
topology: tpu7x:2x2x1
jax: 0.10.0
libtpu: 0.0.40
codegen_flags: <defaults>
</compile_context>

<pallas_src>
import functools

import jax
import jax.numpy as jnp
from jax import lax
from jax.experimental import pallas as pl
from jax.experimental.pallas import tpu as pltpu

_HIGH = lax.Precision.HIGHEST


# --------------------------------- Pallas kernel ------------------------------------
def _upconv_kernel(x_ref, m_ref, w_ref, p_ref, o_ref,
                   *, H, W, C_out, groups, eps, activate):
    """Fused ConvTranspose2d(4, s=2, p=1) + GroupNorm + ELU for one sample.

    x_ref : (1, C_in, H*W)       input sample (channels in sublanes, pixels in lanes)
    m_ref : (9, H*W)             border-validity mask for shift (sy,sx); row (sy+1)*3+(sx+1)
    w_ref : (16*C_out, C_in)     stacked sub-pixel tap weights (tap t -> rows t*C_out..)
    p_ref : (C_out, 3)           packed [bias, gamma, beta] columns
    o_ref : (1, C_out, 4*H*W)    output, sub-pixel layout [pp*H*W + m*W + k], pp = py*2+px
    """
    HW = H * W
    x = x_ref[0]                                              # (C_in, HW) f32

    # ---- all 16 conv taps in ONE MXU dot: Z[t*C_out + co, p] = sum_ci W_t[co,ci]*x[ci,p]
    z = jnp.dot(w_ref[...], x, precision=_HIGH,
                preferred_element_type=jnp.float32)           # (16*C_out, HW)

    # ---- sub-pixel accumulation via lane rolls + border masks --------------------------
    # out[co, 2m+py, 2k+px] = b[co] + sum_{dy,dx} Z_t[co, p + sy*W + sx] * valid(sy,sx,p)
    # with t = ((py*2+px)*2+dy)*2+dx, (sy,sx) = (py+dy-1, px+dx-1), p = m*W + k.
    # roll(shift = (-off) % HW) brings source index p+off to destination p; the mask
    # zeroes destinations whose source pixel (m+sy, k+sx) falls outside the image
    # (this also kills the row-wrap artifacts of the flat roll).
    accs = []
    ch_sum = jnp.zeros((C_out, 1), jnp.float32)               # per-channel sum of acc
    ch_sq = jnp.zeros((C_out, 1), jnp.float32)                # per-channel sum of acc^2
    for py in range(2):
        for px in range(2):
            acc = None
            for dy in range(2):
                for dx in range(2):
                    t = ((py * 2 + px) * 2 + dy) * 2 + dx
                    zt = z[t * C_out:(t + 1) * C_out, :]      # (C_out, HW), 8-aligned slice
                    sy = py + dy - 1
                    sx = px + dx - 1
                    off = sy * W + sx
                    if off != 0:
                        zt = pltpu.roll(zt, (-off) % HW, axis=1)
                    if sy != 0 or sx != 0:
                        sid = (sy + 1) * 3 + (sx + 1)
                        zt = zt * m_ref[sid:sid + 1, :]       # broadcast over sublanes
                    acc = zt if acc is None else acc + zt
            accs.append(acc)
            ch_sum = ch_sum + acc.sum(axis=1, keepdims=True)
            ch_sq = ch_sq + (acc * acc).sum(axis=1, keepdims=True)

    # ---- GroupNorm (one-pass, bias folded analytically) --------------------------------
    p = p_ref[...]
    bias = p[:, 0:1]                                          # (C_out, 1)
    gamma = p[:, 1:2]
    beta = p[:, 2:3]

    npix = 4.0 * float(HW)                                    # pixels per channel (2H*2W)
    gs = C_out // groups
    n_per_group = float(gs) * npix
    inv_n = 1.0 / n_per_group

    # conv = acc + bias;  correct the accumulated sums for the (per-channel) bias,
    # since bias contributes to both the group mean and the group variance.
    conv_sum = ch_sum + bias * npix
    conv_sq = ch_sq + 2.0 * bias * ch_sum + bias * bias * npix

    cidx = lax.broadcasted_iota(jnp.int32, (C_out, 1), 0)     # channel index per sublane
    mean_c = jnp.zeros((C_out, 1), jnp.float32)
    ex2_c = jnp.zeros((C_out, 1), jnp.float32)
    for g in range(groups):
        in_g = (cidx >= g * gs) & (cidx < (g + 1) * gs)       # (C_out, 1) bool
        gf = in_g.astype(jnp.float32)
        mg = jnp.sum(conv_sum * gf) * inv_n                   # group mean   (scalar)
        eg = jnp.sum(conv_sq * gf) * inv_n                    # group E[x^2] (scalar)
        mean_c = jnp.where(in_g, mg, mean_c)
        ex2_c = jnp.where(in_g, eg, ex2_c)
    var_c = ex2_c - mean_c * mean_c

    scale = gamma * lax.rsqrt(var_c + eps)                    # (C_out, 1)
    # y = (acc + bias - mean) * scale + beta  ==  acc * scale + shift
    shift = beta + (bias - mean_c) * scale

    # ---- affine + ELU, stored as four aligned lane-dense 256-lane slabs ----------------
    for pp, acc in enumerate(accs):
        y = acc * scale + shift
        if activate:
            # TODO(synk): expm1 would avoid tiny cancellation near 0-, but exp is the
            # guaranteed-lowerable EUP op; absolute error ~1e-7 is well within tolerance.
            y = jnp.where(y > 0.0, y, jnp.exp(jnp.minimum(y, 0.0)) - 1.0)  # ELU(alpha=1)
        o_ref[0, :, pp * HW:(pp + 1) * HW] = y


# ----------------------------------- wrapper -----------------------------------------
def upconv_unit_forward(x, w_sn, bias, gamma, beta, *, groups, eps=1e-5, activate=True):
    """UpConvUnit forward (bilinear=False path): ConvT(4,s2,p1) -> GroupNorm -> ELU.

    x    : (N, C_in, H, W)      f32 NCHW
    w_sn : (C_in, C_out, 4, 4)  f32 spectrally-normalized ConvTranspose2d weight
    bias : (C_out,); gamma, beta : (C_out,)
    returns (N, C_out, 2H, 2W)  f32
    """
    N, C_in, H, W = x.shape
    C_out = w_sn.shape[1]
    HW = H * W
    assert w_sn.shape == (C_in, C_out, 4, 4)
    assert C_out % groups == 0

    x_flat = x.reshape(N, C_in, HW).astype(jnp.float32)   # free view of contiguous NCHW

    # Stacked sub-pixel tap weights: tap t = ((py*2+px)*2+dy)*2+dx occupies rows
    # [t*C_out, (t+1)*C_out) and equals Wsn[:, :, 3-py-2dy, 3-px-2dx]^T  ((C_out, C_in)).
    taps = []
    for py in range(2):
        for px in range(2):
            for dy in range(2):
                for dx in range(2):
                    taps.append(w_sn[:, :, 3 - py - 2 * dy, 3 - px - 2 * dx].T)
    w_stacked = jnp.concatenate(taps, axis=0).astype(jnp.float32)     # (16*C_out, C_in)

    # Border-validity masks for each shift (sy, sx): mask[(sy+1)*3+(sx+1), m*W+k] = 1
    # iff the SOURCE pixel (m+sy, k+sx) lies inside the image (zero-padding otherwise).
    row = jnp.arange(HW) // W
    col = jnp.arange(HW) % W
    masks = []
    for sy in (-1, 0, 1):
        for sx in (-1, 0, 1):
            valid = ((row + sy >= 0) & (row + sy < H) &
                     (col + sx >= 0) & (col + sx < W))
            masks.append(valid)
    shift_masks = jnp.stack(masks, axis=0).astype(jnp.float32)        # (9, HW)

    # Packed per-channel parameters: columns = [bias, gamma, beta].
    params = jnp.stack([bias, gamma, beta], axis=1).astype(jnp.float32)  # (C_out, 3)

    kernel = functools.partial(_upconv_kernel, H=H, W=W, C_out=C_out,
                               groups=groups, eps=eps, activate=activate)

    out_flat = pl.pallas_call(
        kernel,
        out_shape=jax.ShapeDtypeStruct((N, C_out, 4 * HW), jnp.float32),
        grid_spec=pltpu.PrefetchScalarGridSpec(
            num_scalar_prefetch=0,
            grid=(N,),
            in_specs=[
                pl.BlockSpec((1, C_in, HW), lambda n: (n, 0, 0)),          # x (per sample)
                pl.BlockSpec((9, HW), lambda n: (0, 0)),                   # shift masks
                pl.BlockSpec((16 * C_out, C_in), lambda n: (0, 0)),        # stacked weights
                pl.BlockSpec((C_out, 3), lambda n: (0, 0)),                # bias/gamma/beta
            ],
            out_specs=pl.BlockSpec((1, C_out, 4 * HW), lambda n: (n, 0, 0)),
        ),
        compiler_params=pltpu.CompilerParams(
            dimension_semantics=("parallel",),
        ),
    )(x_flat, shift_masks, w_stacked, params)

    # Depth-to-space: (N, C_out, py, px, H, W) -> (N, C_out, 2H, 2W).
    out = out_flat.reshape(N, C_out, 2, 2, H, W)
    out = jnp.transpose(out, (0, 1, 4, 2, 5, 3))
    return out.reshape(N, C_out, 2 * H, 2 * W)


# ----------------------- spectral norm (parameter glue, host-side) -------------------
def spectral_normalize_convT(weight, u, n_power_iterations=1, eps=1e-12):
    """torch.nn.utils.spectral_norm for ConvTranspose2d (dim=1 matrix view).

    weight: (C_in, C_out, kH, kW).  Returns weight / sigma (one power iteration).
    """
    C_in, C_out, KH, KW = weight.shape
    w_mat = jnp.transpose(weight, (1, 0, 2, 3)).reshape(C_out, -1)   # (C_out, C_in*kH*kW)
    v = None
    for _ in range(n_power_iterations):
        v = w_mat.T @ u
        v = v / (jnp.linalg.norm(v) + eps)
        u = w_mat @ v
        u = u / (jnp.linalg.norm(u) + eps)
    sigma = u @ (w_mat @ v)
    return weight / sigma


# ------------------------------ pure-JAX reference -----------------------------------
def _ref_forward(x, w_sn, bias, gamma, beta, groups, eps=1e-5, activate=True):
    N, C_in, H, W = x.shape
    C_out = w_sn.shape[1]
    # ConvTranspose2d(k=4, s=2, p=1): scatter-accumulate formulation.
    canvas = jnp.zeros((N, C_out, 2 * H + 2, 2 * W + 2), jnp.float32)
    for ky in range(4):
        for kx in range(4):
            contrib = jnp.einsum('nihw,io->nohw', x, w_sn[:, :, ky, kx], precision=_HIGH)
            canvas = canvas.at[:, :, ky:ky + 2 * H:2, kx:kx + 2 * W:2].add(contrib)
    conv = canvas[:, :, 1:1 + 2 * H, 1:1 + 2 * W] + bias[None, :, None, None]
    # GroupNorm
    xg = conv.reshape(N, groups, C_out // groups, 2 * H, 2 * W)
    mean = xg.mean(axis=(2, 3, 4), keepdims=True)
    var = ((xg - mean) ** 2).mean(axis=(2, 3, 4), keepdims=True)
    xn = ((xg - mean) / jnp.sqrt(var + eps)).reshape(N, C_out, 2 * H, 2 * W)
    out = xn * gamma[None, :, None, None] + beta[None, :, None, None]
    # ELU
    return jnp.where(out > 0, out, jnp.expm1(out)) if activate else out


# ---------------------------------------- main ---------------------------------------
if __name__ == "__main__":
    key = jax.random.PRNGKey(0)
    k_x, k_w, k_b, k_u, k_g, k_be = jax.random.split(key, 6)

    # UpConvUnit(in_ch=4, out_ch=8): spectral_norm(ConvTranspose2d(4, 8, 4, stride=2,
    # padding=1)), GroupNorm(out_ch // 4 = 2, 8), ELU.  Input x: (2, 4, 16, 16) NCHW.
    N, C_in, H, W = 2, 4, 16, 16
    C_out = 8
    groups = C_out // 4

    x = jax.random.normal(k_x, (N, C_in, H, W), dtype=jnp.float32)

    # ConvTranspose2d parameter init (kaiming-uniform bounds, fan_in = C_out * k * k).
    fan_in = C_out * 4 * 4
    bound = 1.0 / (fan_in ** 0.5)
    weight = jax.random.uniform(k_w, (C_in, C_out, 4, 4), jnp.float32, -bound, bound)
    bias = jax.random.uniform(k_b, (C_out,), jnp.float32, -bound, bound)

    # spectral_norm's persistent `u` vector (normalized gaussian; dim=1 -> length C_out).
    u0 = jax.random.normal(k_u, (C_out,), dtype=jnp.float32)
    u0 = u0 / (jnp.linalg.norm(u0) + 1e-12)
    w_sn = spectral_normalize_convT(weight, u0)

    # GroupNorm affine params (init is ones/zeros; perturbed to exercise the full math).
    gamma = 1.0 + 0.1 * jax.random.normal(k_g, (C_out,), dtype=jnp.float32)
    beta = 0.1 * jax.random.normal(k_be, (C_out,), dtype=jnp.float32)

    # TODO(synk): bilinear=True branch (nearest Upsample + spectral-norm 3x3 conv) is not
    # implemented; this covers the default ConvTranspose2d branch with act=True.
    out = upconv_unit_forward(x, w_sn, bias, gamma, beta, groups=groups)
    out = jax.block_until_ready(out)

    ref = _ref_forward(x, w_sn, bias, gamma, beta, groups)
    assert out.shape == (N, C_out, 2 * H, 2 * W)
    err = float(jnp.max(jnp.abs(out - ref)))
    assert err < 1e-2, err

    print("KERNEL_OK")
</pallas_src>

<mosaic_0001>
module attributes {stable_mosaic.version = 11 : i64} {
  func.func @_upconv_kernel(%arg0: i32, %arg1: memref<1x4x256xf32, #tpu.memory_space<vmem>>, %arg2: memref<9x256xf32, #tpu.memory_space<vmem>>, %arg3: memref<128x4xf32, #tpu.memory_space<vmem>>, %arg4: memref<8x3xf32, #tpu.memory_space<vmem>>, %arg5: memref<1x8x1024xf32, #tpu.memory_space<vmem>>) attributes {dimension_semantics = [#tpu.dimension_semantics<parallel>], iteration_bounds = array<i64: 2>, scalar_prefetch = 0 : i64, scratch_operands = 0 : i64, tpu.core_type = #tpu.core_type<tc>, window_params = [{transform_indices = @transform_0, window_bounds = array<i64: 1, 4, 256>}, {pipeline_mode = #tpu.pipeline_mode<synchronous>, transform_indices = @transform_1, window_bounds = array<i64: 9, 256>}, {pipeline_mode = #tpu.pipeline_mode<synchronous>, transform_indices = @transform_2, window_bounds = array<i64: 128, 4>}, {pipeline_mode = #tpu.pipeline_mode<synchronous>, transform_indices = @transform_3, window_bounds = array<i64: 8, 3>}, {transform_indices = @transform_4, window_bounds = array<i64: 1, 8, 1024>}]} {
    %c0 = arith.constant 0 : index
    %c0_0 = arith.constant 0 : index
    %c0_1 = arith.constant 0 : index
    %0 = vector.load %arg1[%c0, %c0_0, %c0_1] : memref<1x4x256xf32, #tpu.memory_space<vmem>>, vector<1x4x256xf32>
    %1 = vector.shape_cast %0 : vector<1x4x256xf32> to vector<4x256xf32>
    %c0_2 = arith.constant 0 : index
    %c0_3 = arith.constant 0 : index
    %2 = vector.load %arg3[%c0_2, %c0_3] : memref<128x4xf32, #tpu.memory_space<vmem>>, vector<128x4xf32>
    %cst = arith.constant dense<0.000000e+00> : vector<128x256xf32>
    %3 = tpu.matmul %2, %1, %cst {dimension_numbers = #tpu.dot_dimension_numbers<[1], [0], [0], [1], [0, 0, 1, 1], [], []>, precision = #tpu.contract_precision<fp32>} : vector<128x4xf32>, vector<4x256xf32>, vector<128x256xf32> -> vector<128x256xf32>
    %cst_4 = arith.constant 0.000000e+00 : f32
    %4 = vector.broadcast %cst_4 : f32 to vector<8x1xf32>
    %cst_5 = arith.constant 0.000000e+00 : f32
    %5 = vector.broadcast %cst_5 : f32 to vector<8x1xf32>
    %6 = vector.extract_strided_slice %3 {offsets = [0, 0], sizes = [8, 256], strides = [1, 1]} : vector<128x256xf32> to vector<8x256xf32>
    %c17_i32 = arith.constant 17 : i32
    %7 = tpu.dynamic_rotate %6 by %c17_i32 dim 1 : vector<8x256xf32>, i32 -> vector<8x256xf32>
    %c0_6 = arith.constant 0 : index
    %c0_7 = arith.constant 0 : index
    %8 = vector.load %arg2[%c0_6, %c0_7] : memref<9x256xf32, #tpu.memory_space<vmem>>, vector<1x256xf32>
    %9 = vector.broadcast %8 : vector<1x256xf32> to vector<8x256xf32>
    %10 = arith.mulf %7, %9 : vector<8x256xf32>
    %11 = vector.extract_strided_slice %3 {offsets = [8, 0], sizes = [8, 256], strides = [1, 1]} : vector<128x256xf32> to vector<8x256xf32>
    %c16_i32 = arith.constant 16 : i32
    %12 = tpu.dynamic_rotate %11 by %c16_i32 dim 1 : vector<8x256xf32>, i32 -> vector<8x256xf32>
    %c1 = arith.constant 1 : index
    %c0_8 = arith.constant 0 : index
    %13 = vector.load %arg2[%c1, %c0_8] : memref<9x256xf32, #tpu.memory_space<vmem>>, vector<1x256xf32>
    %14 = vector.broadcast %13 : vector<1x256xf32> to vector<8x256xf32>
    %15 = arith.mulf %12, %14 : vector<8x256xf32>
    %16 = arith.addf %10, %15 : vector<8x256xf32>
    %17 = vector.extract_strided_slice %3 {offsets = [16, 0], sizes = [8, 256], strides = [1, 1]} : vector<128x256xf32> to vector<8x256xf32>
    %c1_i32 = arith.constant 1 : i32
    %18 = tpu.dynamic_rotate %17 by %c1_i32 dim 1 : vector<8x256xf32>, i32 -> vector<8x256xf32>
    %c3 = arith.constant 3 : index
    %c0_9 = arith.constant 0 : index
    %19 = vector.load %arg2[%c3, %c0_9] : memref<9x256xf32, #tpu.memory_space<vmem>>, vector<1x256xf32>
    %20 = vector.broadcast %19 : vector<1x256xf32> to vector<8x256xf32>
    %21 = arith.mulf %18, %20 : vector<8x256xf32>
    %22 = arith.addf %16, %21 : vector<8x256xf32>
    %23 = vector.extract_strided_slice %3 {offsets = [24, 0], sizes = [8, 256], strides = [1, 1]} : vector<128x256xf32> to vector<8x256xf32>
    %24 = arith.addf %22, %23 : vector<8x256xf32>
    %cst_10 = arith.constant dense<0.000000e+00> : vector<8xf32>
    %25 = vector.multi_reduction <add>, %24, %cst_10 [1] : vector<8x256xf32> to vector<8xf32>
    %26 = vector.shape_cast %25 : vector<8xf32> to vector<8x1xf32>
    %27 = arith.addf %4, %26 : vector<8x1xf32>
    %28 = arith.mulf %24, %24 : vector<8x256xf32>
    %cst_11 = arith.constant dense<0.000000e+00> : vector<8xf32>
    %29 = vector.multi_reduction <add>, %28, %cst_11 [1] : vector<8x256xf32> to vector<8xf32>
    %30 = vector.shape_cast %29 : vector<8xf32> to vector<8x1xf32>
    %31 = arith.addf %5, %30 : vector<8x1xf32>
    %32 = vector.extract_strided_slice %3 {offsets = [32, 0], sizes = [8, 256], strides = [1, 1]} : vector<128x256xf32> to vector<8x256xf32>
    %c16_i32_12 = arith.constant 16 : i32
    %33 = tpu.dynamic_rotate %32 by %c16_i32_12 dim 1 : vector<8x256xf32>, i32 -> vector<8x256xf32>
    %c1_13 = arith.constant 1 : index
    %c0_14 = arith.constant 0 : index
    %34 = vector.load %arg2[%c1_13, %c0_14] : memref<9x256xf32, #tpu.memory_space<vmem>>, vector<1x256xf32>
    %35 = vector.broadcast %34 : vector<1x256xf32> to vector<8x256xf32>
    %36 = arith.mulf %33, %35 : vector<8x256xf32>
    %37 = vector.extract_strided_slice %3 {offsets = [40, 0], sizes = [8, 256], strides = [1, 1]} : vector<128x256xf32> to vector<8x256xf32>
    %c15_i32 = arith.constant 15 : i32
    %38 = tpu.dynamic_rotate %37 by %c15_i32 dim 1 : vector<8x256xf32>, i32 -> vector<8x256xf32>
    %c2 = arith.constant 2 : index
    %c0_15 = arith.constant 0 : index
    %39 = vector.load %arg2[%c2, %c0_15] : memref<9x256xf32, #tpu.memory_space<vmem>>, vector<1x256xf32>
    %40 = vector.broadcast %39 : vector<1x256xf32> to vector<8x256xf32>
    %41 = arith.mulf %38, %40 : vector<8x256xf32>
    %42 = arith.addf %36, %41 : vector<8x256xf32>
    %43 = vector.extract_strided_slice %3 {offsets = [48, 0], sizes = [8, 256], strides = [1, 1]} : vector<128x256xf32> to vector<8x256xf32>
    %44 = arith.addf %42, %43 : vector<8x256xf32>
    %45 = vector.extract_strided_slice %3 {offsets = [56, 0], sizes = [8, 256], strides = [1, 1]} : vector<128x256xf32> to vector<8x256xf32>
    %c255_i32 = arith.constant 255 : i32
    %46 = tpu.dynamic_rotate %45 by %c255_i32 dim 1 : vector<8x256xf32>, i32 -> vector<8x256xf32>
    %c5 = arith.constant 5 : index
    %c0_16 = arith.constant 0 : index
    %47 = vector.load %arg2[%c5, %c0_16] : memref<9x256xf32, #tpu.memory_space<vmem>>, vector<1x256xf32>
    %48 = vector.broadcast %47 : vector<1x256xf32> to vector<8x256xf32>
    %49 = arith.mulf %46, %48 : vector<8x256xf32>
    %50 = arith.addf %44, %49 : vector<8x256xf32>
    %cst_17 = arith.constant dense<0.000000e+00> : vector<8xf32>
    %51 = vector.multi_reduction <add>, %50, %cst_17 [1] : vector<8x256xf32> to vector<8xf32>
    %52 = vector.shape_cast %51 : vector<8xf32> to vector<8x1xf32>
    %53 = arith.addf %27, %52 : vector<8x1xf32>
    %54 = arith.mulf %50, %50 : vector<8x256xf32>
    %cst_18 = arith.constant dense<0.000000e+00> : vector<8xf32>
    %55 = vector.multi_reduction <add>, %54, %cst_18 [1] : vector<8x256xf32> to vector<8xf32>
    %56 = vector.shape_cast %55 : vector<8xf32> to vector<8x1xf32>
    %57 = arith.addf %31, %56 : vector<8x1xf32>
    %58 = vector.extract_strided_slice %3 {offsets = [64, 0], sizes = [8, 256], strides = [1, 1]} : vector<128x256xf32> to vector<8x256xf32>
    %c1_i32_19 = arith.constant 1 : i32
    %59 = tpu.dynamic_rotate %58 by %c1_i32_19 dim 1 : vector<8x256xf32>, i32 -> vector<8x256xf32>
    %c3_20 = arith.constant 3 : index
    %c0_21 = arith.constant 0 : index
    %60 = vector.load %arg2[%c3_20, %c0_21] : memref<9x256xf32, #tpu.memory_space<vmem>>, vector<1x256xf32>
    %61 = vector.broadcast %60 : vector<1x256xf32> to vector<8x256xf32>
    %62 = arith.mulf %59, %61 : vector<8x256xf32>
    %63 = vector.extract_strided_slice %3 {offsets = [72, 0], sizes = [8, 256], strides = [1, 1]} : vector<128x256xf32> to vector<8x256xf32>
    %64 = arith.addf %62, %63 : vector<8x256xf32>
    %65 = vector.extract_strided_slice %3 {offsets = [80, 0], sizes = [8, 256], strides = [1, 1]} : vector<128x256xf32> to vector<8x256xf32>
    %c241_i32 = arith.constant 241 : i32
    %66 = tpu.dynamic_rotate %65 by %c241_i32 dim 1 : vector<8x256xf32>, i32 -> vector<8x256xf32>
    %c6 = arith.constant 6 : index
    %c0_22 = arith.constant 0 : index
    %67 = vector.load %arg2[%c6, %c0_22] : memref<9x256xf32, #tpu.memory_space<vmem>>, vector<1x256xf32>
    %68 = vector.broadcast %67 : vector<1x256xf32> to vector<8x256xf32>
    %69 = arith.mulf %66, %68 : vector<8x256xf32>
    %70 = arith.addf %64, %69 : vector<8x256xf32>
    %71 = vector.extract_strided_slice %3 {offsets = [88, 0], sizes = [8, 256], strides = [1, 1]} : vector<128x256xf32> to vector<8x256xf32>
    %c240_i32 = arith.constant 240 : i32
    %72 = tpu.dynamic_rotate %71 by %c240_i32 dim 1 : vector<8x256xf32>, i32 -> vector<8x256xf32>
    %c7 = arith.constant 7 : index
    %c0_23 = arith.constant 0 : index
    %73 = vector.load %arg2[%c7, %c0_23] : memref<9x256xf32, #tpu.memory_space<vmem>>, vector<1x256xf32>
    %74 = vector.broadcast %73 : vector<1x256xf32> to vector<8x256xf32>
    %75 = arith.mulf %72, %74 : vector<8x256xf32>
    %76 = arith.addf %70, %75 : vector<8x256xf32>
    %cst_24 = arith.constant dense<0.000000e+00> : vector<8xf32>
    %77 = vector.multi_reduction <add>, %76, %cst_24 [1] : vector<8x256xf32> to vector<8xf32>
    %78 = vector.shape_cast %77 : vector<8xf32> to vector<8x1xf32>
    %79 = arith.addf %53, %78 : vector<8x1xf32>
    %80 = arith.mulf %76, %76 : vector<8x256xf32>
    %cst_25 = arith.constant dense<0.000000e+00> : vector<8xf32>
    %81 = vector.multi_reduction <add>, %80, %cst_25 [1] : vector<8x256xf32> to vector<8xf32>
    %82 = vector.shape_cast %81 : vector<8xf32> to vector<8x1xf32>
    %83 = arith.addf %57, %82 : vector<8x1xf32>
    %84 = vector.extract_strided_slice %3 {offsets = [96, 0], sizes = [8, 256], strides = [1, 1]} : vector<128x256xf32> to vector<8x256xf32>
    %85 = vector.extract_strided_slice %3 {offsets = [104, 0], sizes = [8, 256], strides = [1, 1]} : vector<128x256xf32> to vector<8x256xf32>
    %c255_i32_26 = arith.constant 255 : i32
    %86 = tpu.dynamic_rotate %85 by %c255_i32_26 dim 1 : vector<8x256xf32>, i32 -> vector<8x256xf32>
    %c5_27 = arith.constant 5 : index
    %c0_28 = arith.constant 0 : index
    %87 = vector.load %arg2[%c5_27, %c0_28] : memref<9x256xf32, #tpu.memory_space<vmem>>, vector<1x256xf32>
    %88 = vector.broadcast %87 : vector<1x256xf32> to vector<8x256xf32>
    %89 = arith.mulf %86, %88 : vector<8x256xf32>
    %90 = arith.addf %84, %89 : vector<8x256xf32>
    %91 = vector.extract_strided_slice %3 {offsets = [112, 0], sizes = [8, 256], strides = [1, 1]} : vector<128x256xf32> to vector<8x256xf32>
    %c240_i32_29 = arith.constant 240 : i32
    %92 = tpu.dynamic_rotate %91 by %c240_i32_29 dim 1 : vector<8x256xf32>, i32 -> vector<8x256xf32>
    %c7_30 = arith.constant 7 : index
    %c0_31 = arith.constant 0 : index
    %93 = vector.load %arg2[%c7_30, %c0_31] : memref<9x256xf32, #tpu.memory_space<vmem>>, vector<1x256xf32>
    %94 = vector.broadcast %93 : vector<1x256xf32> to vector<8x256xf32>
    %95 = arith.mulf %92, %94 : vector<8x256xf32>
    %96 = arith.addf %90, %95 : vector<8x256xf32>
    %97 = vector.extract_strided_slice %3 {offsets = [120, 0], sizes = [8, 256], strides = [1, 1]} : vector<128x256xf32> to vector<8x256xf32>
    %c239_i32 = arith.constant 239 : i32
    %98 = tpu.dynamic_rotate %97 by %c239_i32 dim 1 : vector<8x256xf32>, i32 -> vector<8x256xf32>
    %c8 = arith.constant 8 : index
    %c0_32 = arith.constant 0 : index
    %99 = vector.load %arg2[%c8, %c0_32] : memref<9x256xf32, #tpu.memory_space<vmem>>, vector<1x256xf32>
    %100 = vector.broadcast %99 : vector<1x256xf32> to vector<8x256xf32>
    %101 = arith.mulf %98, %100 : vector<8x256xf32>
    %102 = arith.addf %96, %101 : vector<8x256xf32>
    %cst_33 = arith.constant dense<0.000000e+00> : vector<8xf32>
    %103 = vector.multi_reduction <add>, %102, %cst_33 [1] : vector<8x256xf32> to vector<8xf32>
    %104 = vector.shape_cast %103 : vector<8xf32> to vector<8x1xf32>
    %105 = arith.addf %79, %104 : vector<8x1xf32>
    %106 = arith.mulf %102, %102 : vector<8x256xf32>
    %cst_34 = arith.constant dense<0.000000e+00> : vector<8xf32>
    %107 = vector.multi_reduction <add>, %106, %cst_34 [1] : vector<8x256xf32> to vector<8xf32>
    %108 = vector.shape_cast %107 : vector<8xf32> to vector<8x1xf32>
    %109 = arith.addf %83, %108 : vector<8x1xf32>
    %c0_35 = arith.constant 0 : index
    %c0_36 = arith.constant 0 : index
    %110 = vector.load %arg4[%c0_35, %c0_36] : memref<8x3xf32, #tpu.memory_space<vmem>>, vector<8x3xf32>
    %111 = vector.extract_strided_slice %110 {offsets = [0, 0], sizes = [8, 1], strides = [1, 1]} : vector<8x3xf32> to vector<8x1xf32>
    %112 = vector.extract_strided_slice %110 {offsets = [0, 1], sizes = [8, 1], strides = [1, 1]} : vector<8x3xf32> to vector<8x1xf32>
    %113 = vector.extract_strided_slice %110 {offsets = [0, 2], sizes = [8, 1], strides = [1, 1]} : vector<8x3xf32> to vector<8x1xf32>
    %cst_37 = arith.constant 1.024000e+03 : f32
    %114 = vector.broadcast %cst_37 : f32 to vector<8x1xf32>
    %115 = arith.mulf %111, %114 : vector<8x1xf32>
    %116 = arith.addf %105, %115 : vector<8x1xf32>
    %cst_38 = arith.constant 2.000000e+00 : f32
    %117 = vector.broadcast %cst_38 : f32 to vector<8x1xf32>
    %118 = arith.mulf %117, %111 : vector<8x1xf32>
    %119 = arith.mulf %118, %105 : vector<8x1xf32>
    %120 = arith.addf %109, %119 : vector<8x1xf32>
    %121 = arith.mulf %111, %111 : vector<8x1xf32>
    %cst_39 = arith.constant 1.024000e+03 : f32
    %122 = vector.broadcast %cst_39 : f32 to vector<8x1xf32>
    %123 = arith.mulf %121, %122 : vector<8x1xf32>
    %124 = arith.addf %120, %123 : vector<8x1xf32>
    %125 = tpu.iota {dimensions = array<i32: 0>} : vector<8x1xi32>
    %cst_40 = arith.constant 0.000000e+00 : f32
    %126 = vector.broadcast %cst_40 : f32 to vector<8x1xf32>
    %cst_41 = arith.constant 0.000000e+00 : f32
    %127 = vector.broadcast %cst_41 : f32 to vector<8x1xf32>
    %c0_i32 = arith.constant 0 : i32
    %128 = vector.broadcast %c0_i32 : i32 to vector<8x1xi32>
    %129 = arith.cmpi sge, %125, %128 : vector<8x1xi32>
    %c4_i32 = arith.constant 4 : i32
    %130 = vector.broadcast %c4_i32 : i32 to vector<8x1xi32>
    %131 = arith.cmpi slt, %125, %130 : vector<8x1xi32>
    %132 = arith.andi %129, %131 : vector<8x1xi1>
    %133 = arith.extui %132 : vector<8x1xi1> to vector<8x1xi32>
    %134 = arith.sitofp %133 : vector<8x1xi32> to vector<8x1xf32>
    %135 = arith.mulf %116, %134 : vector<8x1xf32>
    %136 = vector.shape_cast %135 : vector<8x1xf32> to vector<1x8x1xf32>
    %cst_42 = arith.constant dense<0.000000e+00> : vector<1xf32>
    %137 = vector.multi_reduction <add>, %136, %cst_42 [1, 2] : vector<1x8x1xf32> to vector<1xf32>
    %138 = vector.shape_cast %137 : vector<1xf32> to vector<1x1x1xf32>
    %139 = vector.extract %138[0, 0, 0] : f32 from vector<1x1x1xf32>
    %cst_43 = arith.constant 2.44140625E-4 : f32
    %140 = arith.mulf %139, %cst_43 : f32
    %141 = arith.mulf %124, %134 : vector<8x1xf32>
    %142 = vector.shape_cast %141 : vector<8x1xf32> to vector<1x8x1xf32>
    %cst_44 = arith.constant dense<0.000000e+00> : vector<1xf32>
    %143 = vector.multi_reduction <add>, %142, %cst_44 [1, 2] : vector<1x8x1xf32> to vector<1xf32>
    %144 = vector.shape_cast %143 : vector<1xf32> to vector<1x1x1xf32>
    %145 = vector.extract %144[0, 0, 0] : f32 from vector<1x1x1xf32>
    %cst_45 = arith.constant 2.44140625E-4 : f32
    %146 = arith.mulf %145, %cst_45 : f32
    %147 = vector.broadcast %140 : f32 to vector<8x1xf32>
    %148 = arith.select %132, %147, %126 : vector<8x1xi1>, vector<8x1xf32>
    %149 = vector.broadcast %146 : f32 to vector<8x1xf32>
    %150 = arith.select %132, %149, %127 : vector<8x1xi1>, vector<8x1xf32>
    %c4_i32_46 = arith.constant 4 : i32
    %151 = vector.broadcast %c4_i32_46 : i32 to vector<8x1xi32>
    %152 = arith.cmpi sge, %125, %151 : vector<8x1xi32>
    %c8_i32 = arith.constant 8 : i32
    %153 = vector.broadcast %c8_i32 : i32 to vector<8x1xi32>
    %154 = arith.cmpi slt, %125, %153 : vector<8x1xi32>
    %155 = arith.andi %152, %154 : vector<8x1xi1>
    %156 = arith.extui %155 : vector<8x1xi1> to vector<8x1xi32>
    %157 = arith.sitofp %156 : vector<8x1xi32> to vector<8x1xf32>
    %158 = arith.mulf %116, %157 : vector<8x1xf32>
    %159 = vector.shape_cast %158 : vector<8x1xf32> to vector<1x8x1xf32>
    %cst_47 = arith.constant dense<0.000000e+00> : vector<1xf32>
    %160 = vector.multi_reduction <add>, %159, %cst_47 [1, 2] : vector<1x8x1xf32> to vector<1xf32>
    %161 = vector.shape_cast %160 : vector<1xf32> to vector<1x1x1xf32>
    %162 = vector.extract %161[0, 0, 0] : f32 from vector<1x1x1xf32>
    %cst_48 = arith.constant 2.44140625E-4 : f32
    %163 = arith.mulf %162, %cst_48 : f32
    %164 = arith.mulf %124, %157 : vector<8x1xf32>
    %165 = vector.shape_cast %164 : vector<8x1xf32> to vector<1x8x1xf32>
    %cst_49 = arith.constant dense<0.000000e+00> : vector<1xf32>
    %166 = vector.multi_reduction <add>, %165, %cst_49 [1, 2] : vector<1x8x1xf32> to vector<1xf32>
    %167 = vector.shape_cast %166 : vector<1xf32> to vector<1x1x1xf32>
    %168 = vector.extract %167[0, 0, 0] : f32 from vector<1x1x1xf32>
    %cst_50 = arith.constant 2.44140625E-4 : f32
    %169 = arith.mulf %168, %cst_50 : f32
    %170 = vector.broadcast %163 : f32 to vector<8x1xf32>
    %171 = arith.select %155, %170, %148 : vector<8x1xi1>, vector<8x1xf32>
    %172 = vector.broadcast %169 : f32 to vector<8x1xf32>
    %173 = arith.select %155, %172, %150 : vector<8x1xi1>, vector<8x1xf32>
    %174 = arith.mulf %171, %171 : vector<8x1xf32>
    %175 = arith.subf %173, %174 : vector<8x1xf32>
    %cst_51 = arith.constant 9.99999974E-6 : f32
    %176 = vector.broadcast %cst_51 : f32 to vector<8x1xf32>
    %177 = arith.addf %175, %176 : vector<8x1xf32>
    %178 = math.rsqrt %177 : vector<8x1xf32>
    %179 = arith.mulf %112, %178 : vector<8x1xf32>
    %180 = arith.subf %111, %171 : vector<8x1xf32>
    %181 = arith.mulf %180, %179 : vector<8x1xf32>
    %182 = arith.addf %113, %181 : vector<8x1xf32>
    %183 = vector.broadcast %179 : vector<8x1xf32> to vector<8x256xf32>
    %184 = arith.mulf %24, %183 : vector<8x256xf32>
    %185 = vector.broadcast %182 : vector<8x1xf32> to vector<8x256xf32>
    %186 = arith.addf %184, %185 : vector<8x256xf32>
    %cst_52 = arith.constant 0.000000e+00 : f32
    %187 = vector.broadcast %cst_52 : f32 to vector<8x256xf32>
    %188 = arith.cmpf ogt, %186, %187 : vector<8x256xf32>
    %cst_53 = arith.constant 0.000000e+00 : f32
    %189 = vector.broadcast %cst_53 : f32 to vector<8x256xf32>
    %190 = arith.minimumf %186, %189 : vector<8x256xf32>
    %191 = math.exp %190 : vector<8x256xf32>
    %cst_54 = arith.constant 1.000000e+00 : f32
    %192 = vector.broadcast %cst_54 : f32 to vector<8x256xf32>
    %193 = arith.subf %191, %192 : vector<8x256xf32>
    %194 = arith.select %188, %186, %193 : vector<8x256xi1>, vector<8x256xf32>
    %c0_55 = arith.constant 0 : index
    %c0_56 = arith.constant 0 : index
    %c0_57 = arith.constant 0 : index
    %195 = vector.load %arg5[%c0_55, %c0_56, %c0_57] : memref<1x8x1024xf32, #tpu.memory_space<vmem>>, vector<1x8x256xf32>
    %196 = vector.shape_cast %195 : vector<1x8x256xf32> to vector<8x256xf32>
    %197 = vector.shape_cast %194 : vector<8x256xf32> to vector<1x8x256xf32>
    tpu.vector_store %arg5[%c0_55, %c0_56, %c0_57], %197 {strides = array<i32>} : memref<1x8x1024xf32, #tpu.memory_space<vmem>>, vector<1x8x256xf32>,
    %198 = vector.broadcast %179 : vector<8x1xf32> to vector<8x256xf32>
    %199 = arith.mulf %50, %198 : vector<8x256xf32>
    %200 = vector.broadcast %182 : vector<8x1xf32> to vector<8x256xf32>
    %201 = arith.addf %199, %200 : vector<8x256xf32>
    %cst_58 = arith.constant 0.000000e+00 : f32
    %202 = vector.broadcast %cst_58 : f32 to vector<8x256xf32>
    %203 = arith.cmpf ogt, %201, %202 : vector<8x256xf32>
    %cst_59 = arith.constant 0.000000e+00 : f32
    %204 = vector.broadcast %cst_59 : f32 to vector<8x256xf32>
    %205 = arith.minimumf %201, %204 : vector<8x256xf32>
    %206 = math.exp %205 : vector<8x256xf32>
    %cst_60 = arith.constant 1.000000e+00 : f32
    %207 = vector.broadcast %cst_60 : f32 to vector<8x256xf32>
    %208 = arith.subf %206, %207 : vector<8x256xf32>
    %209 = arith.select %203, %201, %208 : vector<8x256xi1>, vector<8x256xf32>
    %c0_61 = arith.constant 0 : index
    %c0_62 = arith.constant 0 : index
    %c256 = arith.constant 256 : index
    %210 = vector.load %arg5[%c0_61, %c0_62, %c256] : memref<1x8x1024xf32, #tpu.memory_space<vmem>>, vector<1x8x256xf32>
    %211 = vector.shape_cast %210 : vector<1x8x256xf32> to vector<8x256xf32>
    %212 = vector.shape_cast %209 : vector<8x256xf32> to vector<1x8x256xf32>
    tpu.vector_store %arg5[%c0_61, %c0_62, %c256], %212 {strides = array<i32>} : memref<1x8x1024xf32, #tpu.memory_space<vmem>>, vector<1x8x256xf32>,
    %213 = vector.broadcast %179 : vector<8x1xf32> to vector<8x256xf32>
    %214 = arith.mulf %76, %213 : vector<8x256xf32>
    %215 = vector.broadcast %182 : vector<8x1xf32> to vector<8x256xf32>
    %216 = arith.addf %214, %215 : vector<8x256xf32>
    %cst_63 = arith.constant 0.000000e+00 : f32
    %217 = vector.broadcast %cst_63 : f32 to vector<8x256xf32>
    %218 = arith.cmpf ogt, %216, %217 : vector<8x256xf32>
    %cst_64 = arith.constant 0.000000e+00 : f32
    %219 = vector.broadcast %cst_64 : f32 to vector<8x256xf32>
    %220 = arith.minimumf %216, %219 : vector<8x256xf32>
    %221 = math.exp %220 : vector<8x256xf32>
    %cst_65 = arith.constant 1.000000e+00 : f32
    %222 = vector.broadcast %cst_65 : f32 to vector<8x256xf32>
    %223 = arith.subf %221, %222 : vector<8x256xf32>
    %224 = arith.select %218, %216, %223 : vector<8x256xi1>, vector<8x256xf32>
    %c0_66 = arith.constant 0 : index
    %c0_67 = arith.constant 0 : index
    %c512 = arith.constant 512 : index
    %225 = vector.load %arg5[%c0_66, %c0_67, %c512] : memref<1x8x1024xf32, #tpu.memory_space<vmem>>, vector<1x8x256xf32>
    %226 = vector.shape_cast %225 : vector<1x8x256xf32> to vector<8x256xf32>
    %227 = vector.shape_cast %224 : vector<8x256xf32> to vector<1x8x256xf32>
    tpu.vector_store %arg5[%c0_66, %c0_67, %c512], %227 {strides = array<i32>} : memref<1x8x1024xf32, #tpu.memory_space<vmem>>, vector<1x8x256xf32>,
    %228 = vector.broadcast %179 : vector<8x1xf32> to vector<8x256xf32>
    %229 = arith.mulf %102, %228 : vector<8x256xf32>
    %230 = vector.broadcast %182 : vector<8x1xf32> to vector<8x256xf32>
    %231 = arith.addf %229, %230 : vector<8x256xf32>
    %cst_68 = arith.constant 0.000000e+00 : f32
    %232 = vector.broadcast %cst_68 : f32 to vector<8x256xf32>
    %233 = arith.cmpf ogt, %231, %232 : vector<8x256xf32>
    %cst_69 = arith.constant 0.000000e+00 : f32
    %234 = vector.broadcast %cst_69 : f32 to vector<8x256xf32>
    %235 = arith.minimumf %231, %234 : vector<8x256xf32>
    %236 = math.exp %235 : vector<8x256xf32>
    %cst_70 = arith.constant 1.000000e+00 : f32
    %237 = vector.broadcast %cst_70 : f32 to vector<8x256xf32>
    %238 = arith.subf %236, %237 : vector<8x256xf32>
    %239 = arith.select %233, %231, %238 : vector<8x256xi1>, vector<8x256xf32>
    %c0_71 = arith.constant 0 : index
    %c0_72 = arith.constant 0 : index
    %c768 = arith.constant 768 : index
    %240 = vector.load %arg5[%c0_71, %c0_72, %c768] : memref<1x8x1024xf32, #tpu.memory_space<vmem>>, vector<1x8x256xf32>
    %241 = vector.shape_cast %240 : vector<1x8x256xf32> to vector<8x256xf32>
    %242 = vector.shape_cast %239 : vector<8x256xf32> to vector<1x8x256xf32>
    tpu.vector_store %arg5[%c0_71, %c0_72, %c768], %242 {strides = array<i32>} : memref<1x8x1024xf32, #tpu.memory_space<vmem>>, vector<1x8x256xf32>,
    return
  }
  func.func @transform_0(%arg0: i32) -> (i32, i32, i32) {
    %c0_i32 = arith.constant 0 : i32
    %c0_i32_0 = arith.constant 0 : i32
    %c0_i32_1 = arith.constant 0 : i32
    return %arg0, %c0_i32, %c0_i32_0 : i32, i32, i32
  }
  func.func @transform_1(%arg0: i32) -> (i32, i32) {
    %c0_i32 = arith.constant 0 : i32
    %c0_i32_0 = arith.constant 0 : i32
    %c0_i32_1 = arith.constant 0 : i32
    return %c0_i32, %c0_i32_0 : i32, i32
  }
  func.func @transform_2(%arg0: i32) -> (i32, i32) {
    %c0_i32 = arith.constant 0 : i32
    %c0_i32_0 = arith.constant 0 : i32
    %c0_i32_1 = arith.constant 0 : i32
    return %c0_i32, %c0_i32_0 : i32, i32
  }
  func.func @transform_3(%arg0: i32) -> (i32, i32) {
    %c0_i32 = arith.constant 0 : i32
    %c0_i32_0 = arith.constant 0 : i32
    %c0_i32_1 = arith.constant 0 : i32
    return %c0_i32, %c0_i32_0 : i32, i32
  }
  func.func @transform_4(%arg0: i32) -> (i32, i32, i32) {
    %c0_i32 = arith.constant 0 : i32
    %c0_i32_0 = arith.constant 0 : i32
    %c0_i32_1 = arith.constant 0 : i32
    return %arg0, %c0_i32, %c0_i32_0 : i32, i32, i32
  }
}

</mosaic_0001>

<bundles_post_ra>
// kernel: tpu_custom_call.1
= control target key start
LH: loop header
LB: loop body
LE: loop exit
PB: predicated region body
PF: predicated region fallthrough
CT: control target
= control target key end

     0   :  { %9 = vsyncpa [#allocation3], 0  ;;  %s3051_s0 = inlined_call_operand.vmem [shape: f32[2,4,256], index: 0, kind: input, shape index: {}]   ;;  %s3052_s1 = inlined_call_operand.vmem [shape: f32[9,256], index: 1, kind: input, shape index: {}]   ;;  %s3053_s2 = inlined_call_operand.vmem [shape: f32[128,4], index: 2, kind: input, shape index: {}]   ;;  %s3054_s3 = inlined_call_operand.vmem [shape: f32[8,3], index: 3, kind: input, shape index: {}]   ;;  %s3055_s4 = inlined_call_operand.hbm [shape: f32[2,8,1024], index: 4, kind: output, shape index: {}]  }
   0x1   :  { %11 = vsyncpa [#allocation3 + $0x1], 0  ;;  %s2365_s15 = smov 0   ;;  %s2367_s16 = smov 0  }
   0x2   :  { %s2369_s17 = smov 0   ;;  %s2371_s18 = smov 0  }
   0x3 LB: > { %s2386_s19 = sadd.s32 4294967295, %s2325_s18   ;;  %s1991_s20 = sadd.s32 4294967294, %s2325_s18   ;;  %s2325_s18 = sphi %s2371_s18, %s3061_s18   ;;  %s2321_s17 = sphi %s2369_s17, %s3060_s17   ;;  %s2317_s16 = sphi %s2367_s16, %s3059_s16   ;;  %s2313_s15 = sphi %s2365_s15, %s3058_s15  }
   0x4   : > { %s2390_s21 = sadd.s32 1, %s2325_s18   ;;  %s113_s22 = sadd.s32 1, %s2321_s17 }
   0x5   : > { %s110_s23 = ssub.s32 %s2325_s18, %s2390_s21  ;;  %p123_p0 = scmp.ne.s32.totalorder %s2321_s17, %s2317_s16 }
   0x6   : > { %p111_p1 = scmp.eq.s32.totalorder %s110_s23, 0  ;;  %p124_p2 = scmp.eq.s32.totalorder %s2386_s19, 1 }
   0x7   : > { %p129_p3 = scmp.ne.s32.totalorder %s2317_s16, %s2313_s15  ;;  %p130_p4 = scmp.eq.s32.totalorder %s1991_s20, 1 }
   0x8   : > { %s2401_s24 = scalar_select %p111_p1, %s2321_s17, %s113_s22  }
   0x9   : > { %p2403_p5 = por %p124_p2, %p123_p0  ;;  %p2407_p6 = por %p130_p4, %p129_p3 }
   0xa   : > { %p1994_p7 = scmp.ge.s32.totalorder %s2325_s18, 1  ;;  %p165_p8 = scmp.lt.s32.totalorder %s2325_s18, 3 }
   0xc   : > { %p166_p9 = pnand %p1994_p7, %p165_p8 }
   0xd   : > { %p191_p10 = scmp.lt.s32.totalorder (!%p166_p9), %s2386_s19, 1  ;;  %v197_v0 = vld [vmem:[%s3053_s2] sm:$0xff] (!%p166_p9)  ;;  %vm215_vm0 = vcmask (!%p166_p9), 31744   ;;  %v198_v1 = vld [vmem:[%s3053_s2 + $0x8] sm:$0xff] (!%p166_p9)  ;;  %v2327_v2 = vmov (!%p166_p9), 0.0   ;;  %v199_v5 = vld [vmem:[%s3053_s2 + $0x10] sm:$0xff] (!%p166_p9) }
   0xe   : > { %169 = sbr.rel (%p166_p9) target bundleno = 1343 (0x53f), region = 36  ;;  %335 = vmatprep.mubr.f32.mxu1 (!%p166_p9), %v2327_v2  ;;  %962 = vmatprep.mubr.f32.mxu0 (!%p166_p9), %v2327_v2  ;;  %v217_v3 = vsel (!%p166_p9), %vm215_vm0, %v197_v0, 0  ;;  %v220_v4 = vsel (!%p166_p9), %vm215_vm0, %v198_v1, 0  ;;  %v200_v6 = vld [vmem:[%s3053_s2 + $0x18] sm:$0xff] (!%p166_p9)  ;;  %v223_v9 = vsel (!%p166_p9), %vm215_vm0, %v199_v5, 0  ;;  %v201_v12 = vld [vmem:[%s3053_s2 + $0x20] sm:$0xff] (!%p166_p9) }
   0xf   : > { %v2431_v7 = vand.u32 (!%p166_p9), 4294901760, %v217_v3  ;;  %v2433_v8 = vand.u32 (!%p166_p9), 4294901760, %v220_v4  ;;  %v226_v10 = vsel (!%p166_p9), %vm215_vm0, %v200_v6, 0  ;;  %v2437_v11 = vand.u32 (!%p166_p9), 4294901760, %v223_v9  ;;  %v202_v17 = vld [vmem:[%s3053_s2 + $0x28] sm:$0xff] (!%p166_p9)  ;;  %v203_v37 = vld [vmem:[%s3053_s2 + $0x30] sm:$0xff] (!%p166_p9) }
  0x10   : > { %vm264_vm1 = vcmask (!%p166_p9), 1043456   ;;  %v2454_v16 = vand.u32 (!%p166_p9), 4294901760, %v226_v10  ;;  %v229_v21 = vsel (!%p166_p9), %vm215_vm0, %v201_v12, 0  ;;  %v232_v26 = vsel (!%p166_p9), %vm215_vm0, %v202_v17, 0  ;;  %v204_v47 = vld [vmem:[%s3053_s2 + $0x38] sm:$0xff] (!%p166_p9)  ;;  %v205_v56 = vld [vmem:[%s3053_s2 + $0x40] sm:$0xff] (!%p166_p9) }
  0x11   : > { %v2443_v13 = vsub.f32 (!%p166_p9), %v217_v3, %v2431_v7  ;;  %v2446_v14 = vsub.f32 (!%p166_p9), %v220_v4, %v2433_v8  ;;  %v2452_v15 = vsub.f32 (!%p166_p9), %v223_v9, %v2437_v11  ;;  %v2472_v30 = vand.u32 (!%p166_p9), 4294901760, %v229_v21  ;;  %v206_v63 = vld [vmem:[%s3053_s2 + $0x48] sm:$0xff] (!%p166_p9)  ;;  %v207_v9 = vld [vmem:[%s3053_s2 + $0x50] sm:$0xff] (!%p166_p9)  ;;  %s2328_s30 = smov (!%p166_p9), 17   ;;  %s2329_s5 = smov (!%p166_p9), 16  }
  0x12   : > { %v2470_v29 = vsub.f32 (!%p166_p9), %v226_v10, %v2454_v16  ;;  %v2488_v40 = vand.u32 (!%p166_p9), 4294901760, %v232_v26  ;;  %v235_v45 = vsel (!%p166_p9), %vm215_vm0, %v203_v37, 0  ;;  %v238_v55 = vsel (!%p166_p9), %vm215_vm0, %v204_v47, 0  ;;  %s2330_s6 = smov (!%p166_p9), 1   ;;  %s2331_s7 = smov (!%p166_p9), 15  }
  0x13   : > { %v338_v19 = vand.u32 (!%p166_p9), 4294901760, %v2443_v13  ;;  %v349_v20 = vand.u32 (!%p166_p9), 4294901760, %v2446_v14  ;;  %v360_v28 = vand.u32 (!%p166_p9), 4294901760, %v2452_v15  ;;  %v2486_v39 = vsub.f32 (!%p166_p9), %v229_v21, %v2472_v30  ;;  %s2332_s8 = smov (!%p166_p9), 127   ;;  %s2334_s10 = smov (!%p166_p9), 112  }
  0x14   : > { %v371_v38 = vand.u32 (!%p166_p9), 4294901760, %v2470_v29  ;;  %v2500_v50 = vsub.f32 (!%p166_p9), %v232_v26, %v2488_v40  ;;  %v2503_v54 = vand.u32 (!%p166_p9), 4294901760, %v235_v45  ;;  %v2516_v61 = vand.u32 (!%p166_p9), 4294901760, %v238_v55  ;;  %s2335_s11 = smov (!%p166_p9), 111  }
  0x15   : > { %s192_s9 = scalar_select %p191_p10, %s2386_s19, 1  ;;  %v339_v25 = vsub.f32 %v2443_v13, %v338_v19  ;;  %v350_v34 = vsub.f32 %v2446_v14, %v349_v20  ;;  %v361_v44 = vsub.f32 %v2452_v15, %v360_v28  ;;  %v382_v49 = vand.u32 4294901760, %v2486_v39 }
  0x16   : > { %v372_v53 = vsub.f32 %v2470_v29, %v371_v38  ;;  %v393_v58 = vand.u32 4294901760, %v2500_v50  ;;  %v2514_v60 = vsub.f32 %v235_v45, %v2503_v54  ;;  %v241_v62 = vsel %vm215_vm0, %v205_v56, 0  ;;  %v212_v56 = vld [vmem:[%s3053_s2 + $0x78] sm:$0xff] }
  0x17   : > { %s2020_s12 = sshll.u32 %s192_s9, 3  ;;  %v340_v33 = vand.u32 4294901760, %v339_v25  ;;  %v351_v41 = vand.u32 4294901760, %v350_v34  ;;  %v362_v52 = vand.u32 4294901760, %v361_v44  ;;  %v383_v57 = vsub.f32 %v2486_v39, %v382_v49  ;;  %s2333_s9 = smov 113  }
  0x18   : > { %s195_s20 = scalar_lea.vmem %s3051_s0, %s2020_s12  ;;  %v373_v59 = vand.u32 4294901760, %v372_v53  ;;  %v394_v1 = vsub.f32 %v2500_v50, %v393_v58  ;;  %v404_v3 = vand.u32 4294901760, %v2514_v60  ;;  %v2527_v4 = vsub.f32 %v238_v55, %v2516_v61 }
  0x19   : > { %v196_v18 = vld [vmem:[%s195_s20] sm:$0xff]  ;;  %v384_v0 = vand.u32 4294901760, %v383_v57  ;;  %v2529_v5 = vand.u32 4294901760, %v241_v62  ;;  %v244_v6 = vsel %vm215_vm0, %v206_v63, 0  ;;  %v247_v21 = vsel %vm215_vm0, %v207_v9, 0 }
  0x1a   : > { %v214_v22 = vcombine.high %v196_v18, %v196_v18  ;;  %v265_v23 = vsel %vm264_vm1, %v196_v18, 0  ;;  %v2537_v10 = vand.u32 4294901760, %v244_v6  ;;  %v395_v12 = vand.u32 4294901760, %v394_v1 }
  0x1b   : > { %v2463_v24 = vand.u32 4294901760, %v265_v23  ;;  %v405_v17 = vsub.f32 %v2514_v60, %v404_v3  ;;  %v415_v18 = vand.u32 4294901760, %v2527_v4  ;;  %vm1759_vm12 = vcmask 7168  }
  0x1c   : > { %v267_v27 = vsel %vm264_vm1, %v214_v22, 0  ;;  %v2551_v22 = vsub.f32 %v244_v6, %v2537_v10 }
  0x1d   : > { %v269_v31 = vand.u32 4294901760, %v267_v27  ;;  %v2475_v32 = vsub.f32 %v265_v23, %v2463_v24  ;;  %v406_v25 = vand.u32 4294901760, %v405_v17  ;;  %v416_v26 = vsub.f32 %v2527_v4, %v415_v18 }
  0x1f   : > { %270 = vmatprep.subr.mxu1 %v269_v31  ;;  %897 = vmatprep.subr.mxu0 %v269_v31  ;;  %v513_v35 = vsub.f32 %v267_v27, %v269_v31  ;;  %v520_v36 = vand.u32 4294901760, %v2475_v32  ;;  %v417_v34 = vand.u32 4294901760, %v416_v26 }
  0x20   : > { %272 = vmatpush1.msra.mxu1 %v2463_v24  ;;  %899 = vmatpush1.msra.mxu0 %v2463_v24 }
  0x21   : > { %341 = vmatmul.mubr.f32.vlgmr.msra.gmra.mrb[0].mxu1 %v340_v33  ;;  %966 = vmatmul.mubr.f32.vlgmr.msra.gmra.mrb[0].mxu0 %v338_v19  ;;  %v514_v42 = vand.u32 4294901760, %v513_v35  ;;  %v521_v43 = vsub.f32 %v2475_v32, %v520_v36  ;;  %v2542_v19 = vsub.f32 %v241_v62, %v2529_v5 }
  0x22   : > { %346 = vmatprep.mubr.f32.mxu1 %v2327_v2  ;;  %971 = vmatprep.mubr.f32.mxu0 %v2327_v2 }
  0x23   : > { %v515_v46 = vsub.f32 %v513_v35, %v514_v42  ;;  %1110 = vmatprep.subr.mxu0 %v514_v42  ;;  %v522_v48 = vand.u32 4294901760, %v521_v43  ;;  %v426_v27 = vand.u32 4294901760, %v2542_v19 }
  0x24   : > { %1114 = vmatpush1.msra.mxu0 %v520_v36  ;;  %v437_v36 = vand.u32 4294901760, %v2551_v22 }
  0x25   : > { %352 = vmatmul.mubr.f32.gmra.mrb[2].mxu1 %v351_v41  ;;  %975 = vmatmul.mubr.f32.gmra.mrb[2].mxu0 %v349_v20  ;;  %v516_v51 = vand.u32 4294901760, %v515_v46  ;;  %v208_v20 = vld [vmem:[%s3053_s2 + $0x58] sm:$0xff]  ;;  %v210_v41 = vld [vmem:[%s3053_s2 + $0x68] sm:$0xff] }
  0x26   : > { %357 = vmatprep.mubr.f32.mxu1 %v2327_v2  ;;  %980 = vmatprep.mubr.f32.mxu0 %v2327_v2  ;;  %v250_v23 = vsel %vm215_vm0, %v208_v20, 0  ;;  %v438_v44 = vsub.f32 %v2551_v22, %v437_v36  ;;  %v256_v47 = vsel %vm215_vm0, %v210_v41, 0 }
  0x27   : > { %517 = vmatprep.subr.mxu1 %v516_v51  ;;  %1291 = vmatprep.subr.mxu0 %v269_v31  ;;  %v209_v31 = vld [vmem:[%s3053_s2 + $0x60] sm:$0xff]  ;;  %v2563_v33 = vand.u32 4294901760, %v250_v23  ;;  %v2594_v55 = vand.u32 4294901760, %v256_v47 }
  0x28   : > { %523 = vmatpush1.msra.mxu1 %v522_v48  ;;  %v211_v48 = vld [vmem:[%s3053_s2 + $0x70] sm:$0xff]  ;;  %v439_v51 = vand.u32 4294901760, %v438_v44 }
  0x29   : > { %363 = vmatmul.mubr.f32.gmra.mrb[4].mxu1 %v362_v52  ;;  %984 = vmatmul.mubr.f32.gmra.mrb[4].mxu0 %v360_v28  ;;  %v2556_v28 = vand.u32 4294901760, %v247_v21  ;;  %v2577_v42 = vsub.f32 %v250_v23, %v2563_v33  ;;  %v259_v57 = vsel %vm215_vm0, %v211_v48, 0 }
  0x2a   : > { %368 = vmatprep.mubr.f32.mxu1 %v2327_v2  ;;  %989 = vmatprep.mubr.f32.mxu0 %v2327_v2  ;;  %v2608_v1 = vand.u32 4294901760, %v259_v57 }
  0x2b   : > { %701 = vmatprep.subr.mxu1 %v513_v35  ;;  %v427_v35 = vsub.f32 %v2542_v19, %v426_v27  ;;  %v2568_v37 = vsub.f32 %v247_v21, %v2556_v28 }
  0x2c   : > { %v2617_v17 = vsub.f32 %v259_v57, %v2608_v1 }
  0x2d   : > { %374 = vmatmul.mubr.f32.gmra.mrb[6].mxu1 %v373_v59  ;;  %993 = vmatmul.mubr.f32.gmra.mrb[6].mxu0 %v371_v38  ;;  %v253_v38 = vsel %vm215_vm0, %v209_v31, 0  ;;  %v428_v43 = vand.u32 4294901760, %v427_v35  ;;  %v448_v45 = vand.u32 4294901760, %v2568_v37  ;;  %v262_v59 = vsel %vm215_vm0, %v212_v56, 0 }
  0x2e   : > { %379 = vmatprep.mubr.f32.mxu1 %v2327_v2  ;;  %998 = vmatprep.mubr.f32.mxu0 %v2327_v2  ;;  %v2581_v46 = vand.u32 4294901760, %v253_v38  ;;  %v492_v21 = vand.u32 4294901760, %v2617_v17 }
  0x2f   : > { %v449_v52 = vsub.f32 %v2568_v37, %v448_v45 }
  0x30   : > { %v2592_v53 = vsub.f32 %v253_v38, %v2581_v46  ;;  %v493_v26 = vsub.f32 %v2617_v17, %v492_v21 }
  0x31   : > { %385 = vmatmul.mubr.f32.gmra.mrb[8].mxu1 %v384_v0  ;;  %1002 = vmatmul.mubr.f32.gmra.mrb[8].mxu0 %v382_v49  ;;  %v459_v49 = vand.u32 4294901760, %v2577_v42  ;;  %v450_v62 = vand.u32 4294901760, %v449_v52  ;;  %v2606_v0 = vsub.f32 %v256_v47, %v2594_v55 }
  0x32   : > { %390 = vmatprep.mubr.f32.mxu1 %v2327_v2  ;;  %1007 = vmatprep.mubr.f32.mxu0 %v2327_v2  ;;  %v470_v63 = vand.u32 4294901760, %v2592_v53  ;;  %v494_v31 = vand.u32 4294901760, %v493_v26 }
  0x34   : > { %v471_v9 = vsub.f32 %v2592_v53, %v470_v63 }
  0x35   : > { %396 = vmatmul.mubr.f32.gmra.mrb[10].mxu1 %v395_v12  ;;  %1011 = vmatmul.mubr.f32.gmra.mrb[10].mxu0 %v393_v58  ;;  %v460_v58 = vsub.f32 %v2577_v42, %v459_v49  ;;  %v481_v12 = vand.u32 4294901760, %v2606_v0 }
  0x36   : > { %401 = vmatprep.mubr.f32.mxu1 %v2327_v2  ;;  %1016 = vmatprep.mubr.f32.mxu0 %v2327_v2 }
  0x37   : > { %v461_v6 = vand.u32 4294901760, %v460_v58  ;;  %v482_v20 = vsub.f32 %v2606_v0, %v481_v12 }
  0x39   : > { %407 = vmatmul.mubr.f32.gmra.mrb[12].mxu1 %v406_v25  ;;  %1020 = vmatmul.mubr.f32.gmra.mrb[12].mxu0 %v404_v3  ;;  %v2612_v3 = vand.u32 4294901760, %v262_v59  ;;  %v483_v25 = vand.u32 4294901760, %v482_v20 }
  0x3a   : > { %412 = vmatprep.mubr.f32.mxu1 %v2327_v2  ;;  %1025 = vmatprep.mubr.f32.mxu0 %v2327_v2 }
  0x3b   : > { %v2624_v23 = vsub.f32 %v262_v59, %v2612_v3 }
  0x3d   : > { %418 = vmatmul.mubr.f32.gmra.mrb[14].mxu1 %v417_v34  ;;  %1029 = vmatmul.mubr.f32.gmra.mrb[14].mxu0 %v415_v18  ;;  %v472_v18 = vand.u32 4294901760, %v471_v9 }
  0x3e   : > { %423 = vmatprep.mubr.f32.mxu1 %v2327_v2  ;;  %1034 = vmatprep.mubr.f32.mxu0 %v2327_v2 }
  0x41   : > { %429 = vmatmul.mubr.f32.gmra.mrb[16].mxu1 %v428_v43  ;;  %1038 = vmatmul.mubr.f32.gmra.mrb[16].mxu0 %v426_v27  ;;  %v503_v27 = vand.u32 4294901760, %v2624_v23 }
  0x42   : > { %434 = vmatprep.mubr.f32.mxu1 %v2327_v2  ;;  %1043 = vmatprep.mubr.f32.mxu0 %v2327_v2 }
  0x43   : > { %v504_v34 = vsub.f32 %v2624_v23, %v503_v27 }
  0x45   : > { %440 = vmatmul.mubr.f32.gmra.mrb[18].mxu1 %v439_v51  ;;  %1047 = vmatmul.mubr.f32.gmra.mrb[18].mxu0 %v437_v36  ;;  %v505_v35 = vand.u32 4294901760, %v504_v34 }
  0x46   : > { %445 = vmatprep.mubr.f32.mxu1 %v2327_v2  ;;  %1052 = vmatprep.mubr.f32.mxu0 %v2327_v2 }
  0x49   : > { %451 = vmatmul.mubr.f32.gmra.mrb[20].mxu1 %v450_v62  ;;  %1056 = vmatmul.mubr.f32.gmra.mrb[20].mxu0 %v448_v45 }
  0x4a   : > { %456 = vmatprep.mubr.f32.mxu1 %v2327_v2  ;;  %1061 = vmatprep.mubr.f32.mxu0 %v2327_v2 }
  0x4d   : > { %462 = vmatmul.mubr.f32.gmra.mrb[22].mxu1 %v461_v6  ;;  %1065 = vmatmul.mubr.f32.gmra.mrb[22].mxu0 %v459_v49 }
  0x4e   : > { %467 = vmatprep.mubr.f32.mxu1 %v2327_v2  ;;  %1070 = vmatprep.mubr.f32.mxu0 %v2327_v2 }
  0x51   : > { %473 = vmatmul.mubr.f32.gmra.mrb[24].mxu1 %v472_v18  ;;  %1074 = vmatmul.mubr.f32.gmra.mrb[24].mxu0 %v470_v63 }
  0x52   : > { %478 = vmatprep.mubr.f32.mxu1 %v2327_v2  ;;  %1079 = vmatprep.mubr.f32.mxu0 %v2327_v2 }
  0x55   : > { %484 = vmatmul.mubr.f32.gmra.mrb[26].mxu1 %v483_v25  ;;  %1083 = vmatmul.mubr.f32.gmra.mrb[26].mxu0 %v481_v12 }
  0x56   : > { %489 = vmatprep.mubr.f32.mxu1 %v2327_v2  ;;  %1088 = vmatprep.mubr.f32.mxu0 %v2327_v2 }
  0x59   : > { %495 = vmatmul.mubr.f32.gmra.mrb[28].mxu1 %v494_v31  ;;  %1092 = vmatmul.mubr.f32.gmra.mrb[28].mxu0 %v492_v21 }
  0x5a   : > { %500 = vmatprep.mubr.f32.mxu1 %v2327_v2  ;;  %1097 = vmatprep.mubr.f32.mxu0 %v2327_v2 }
  0x5d   : > { %506 = vmatmul.mubr.f32.gmra.mrb[30].mxu1 %v505_v35  ;;  %1101 = vmatmul.mubr.f32.gmra.mrb[30].mxu0 %v503_v27 }
  0x5e   : > { %586 = vmatprep.mubr.f32.mxu1 %v2327_v2  ;;  %1177 = vmatprep.mubr.f32.mxu0 %v2327_v2 }
  0x61   : > { %588 = vmatmul.mubr.f32.vlgmr.msra.gmra.mrb[0].mxu1 %v2431_v7  ;;  %1179 = vmatmul.mubr.f32.vlgmr.msra.gmra.mrb[0].mxu0 %v2431_v7 }
  0x62   : > { %593 = vmatprep.mubr.f32.mxu1 %v2327_v2  ;;  %1184 = vmatprep.mubr.f32.mxu0 %v2327_v2 }
  0x63   : > { %704 = vmatpush1.msra.mxu1 %v2475_v32  ;;  %1293 = vmatpush1.msra.mxu0 %v2463_v24 }
  0x65   : > { %595 = vmatmul.mubr.f32.gmra.mrb[2].mxu1 %v2433_v8  ;;  %1186 = vmatmul.mubr.f32.gmra.mrb[2].mxu0 %v2433_v8 }
  0x66   : > { %600 = vmatprep.mubr.f32.mxu1 %v2327_v2  ;;  %1191 = vmatprep.mubr.f32.mxu0 %v2327_v2 }
  0x69   : > { %602 = vmatmul.mubr.f32.gmra.mrb[4].mxu1 %v2437_v11  ;;  %1193 = vmatmul.mubr.f32.gmra.mrb[4].mxu0 %v2437_v11 }
  0x6a   : > { %607 = vmatprep.mubr.f32.mxu1 %v2327_v2  ;;  %1198 = vmatprep.mubr.f32.mxu0 %v2327_v2 }
  0x6d   : > { %609 = vmatmul.mubr.f32.gmra.mrb[6].mxu1 %v2454_v16  ;;  %1200 = vmatmul.mubr.f32.gmra.mrb[6].mxu0 %v2454_v16 }
  0x6e   : > { %614 = vmatprep.mubr.f32.mxu1 %v2327_v2  ;;  %1205 = vmatprep.mubr.f32.mxu0 %v2327_v2 }
  0x71   : > { %616 = vmatmul.mubr.f32.gmra.mrb[8].mxu1 %v2472_v30  ;;  %1207 = vmatmul.mubr.f32.gmra.mrb[8].mxu0 %v2472_v30 }
  0x72   : > { %621 = vmatprep.mubr.f32.mxu1 %v2327_v2  ;;  %1212 = vmatprep.mubr.f32.mxu0 %v2327_v2 }
  0x75   : > { %623 = vmatmul.mubr.f32.gmra.mrb[10].mxu1 %v2488_v40  ;;  %1214 = vmatmul.mubr.f32.gmra.mrb[10].mxu0 %v2488_v40 }
  0x76   : > { %628 = vmatprep.mubr.f32.mxu1 %v2327_v2  ;;  %1219 = vmatprep.mubr.f32.mxu0 %v2327_v2 }
  0x79   : > { %630 = vmatmul.mubr.f32.gmra.mrb[12].mxu1 %v2503_v54  ;;  %1221 = vmatmul.mubr.f32.gmra.mrb[12].mxu0 %v2503_v54 }
  0x7a   : > { %635 = vmatprep.mubr.f32.mxu1 %v2327_v2  ;;  %1226 = vmatprep.mubr.f32.mxu0 %v2327_v2 }
  0x7d   : > { %637 = vmatmul.mubr.f32.gmra.mrb[14].mxu1 %v2516_v61  ;;  %1228 = vmatmul.mubr.f32.gmra.mrb[14].mxu0 %v2516_v61 }
  0x7e   : > { %642 = vmatprep.mubr.f32.mxu1 %v2327_v2  ;;  %1233 = vmatprep.mubr.f32.mxu0 %v2327_v2 }
  0x81   : > { %644 = vmatmul.mubr.f32.gmra.mrb[16].mxu1 %v2529_v5  ;;  %1235 = vmatmul.mubr.f32.gmra.mrb[16].mxu0 %v2529_v5 }
  0x82   : > { %649 = vmatprep.mubr.f32.mxu1 %v2327_v2  ;;  %1240 = vmatprep.mubr.f32.mxu0 %v2327_v2 }
  0x85   : > { %651 = vmatmul.mubr.f32.gmra.mrb[18].mxu1 %v2537_v10  ;;  %1242 = vmatmul.mubr.f32.gmra.mrb[18].mxu0 %v2537_v10 }
  0x86   : > { %656 = vmatprep.mubr.f32.mxu1 %v2327_v2  ;;  %1247 = vmatprep.mubr.f32.mxu0 %v2327_v2 }
  0x89   : > { %658 = vmatmul.mubr.f32.gmra.mrb[20].mxu1 %v2556_v28  ;;  %1249 = vmatmul.mubr.f32.gmra.mrb[20].mxu0 %v2556_v28 }
  0x8a   : > { %663 = vmatprep.mubr.f32.mxu1 %v2327_v2  ;;  %1254 = vmatprep.mubr.f32.mxu0 %v2327_v2 }
  0x8d   : > { %665 = vmatmul.mubr.f32.gmra.mrb[22].mxu1 %v2563_v33  ;;  %1256 = vmatmul.mubr.f32.gmra.mrb[22].mxu0 %v2563_v33 }
  0x8e   : > { %670 = vmatprep.mubr.f32.mxu1 %v2327_v2  ;;  %1261 = vmatprep.mubr.f32.mxu0 %v2327_v2 }
  0x91   : > { %672 = vmatmul.mubr.f32.gmra.mrb[24].mxu1 %v2581_v46  ;;  %1263 = vmatmul.mubr.f32.gmra.mrb[24].mxu0 %v2581_v46 }
  0x92   : > { %677 = vmatprep.mubr.f32.mxu1 %v2327_v2  ;;  %1268 = vmatprep.mubr.f32.mxu0 %v2327_v2 }
  0x95   : > { %679 = vmatmul.mubr.f32.gmra.mrb[26].mxu1 %v2594_v55  ;;  %1270 = vmatmul.mubr.f32.gmra.mrb[26].mxu0 %v2594_v55 }
  0x96   : > { %684 = vmatprep.mubr.f32.mxu1 %v2327_v2  ;;  %1275 = vmatprep.mubr.f32.mxu0 %v2327_v2 }
  0x99   : > { %686 = vmatmul.mubr.f32.gmra.mrb[28].mxu1 %v2608_v1  ;;  %1277 = vmatmul.mubr.f32.gmra.mrb[28].mxu0 %v2608_v1 }
  0x9a   : > { %691 = vmatprep.mubr.f32.mxu1 %v2327_v2  ;;  %1282 = vmatprep.mubr.f32.mxu0 %v2327_v2 }
  0x9d   : > { %693 = vmatmul.mubr.f32.gmra.mrb[30].mxu1 %v2612_v3  ;;  %1284 = vmatmul.mubr.f32.gmra.mrb[30].mxu0 %v2612_v3 }
  0x9e   : > { %767 = vmatprep.mubr.f32.mxu1 %v2327_v2  ;;  %1356 = vmatprep.mubr.f32.mxu0 %v2327_v2 }
  0xa1   : > { %770 = vmatmul.mubr.f32.vlgmr.msra.gmra.mrb[0].mxu1 %v2443_v13  ;;  %1358 = vmatmul.mubr.f32.vlgmr.msra.gmra.mrb[0].mxu0 %v2431_v7 }
  0xa2   : > { %775 = vmatprep.mubr.f32.mxu1 %v2327_v2  ;;  %1363 = vmatprep.mubr.f32.mxu0 %v2327_v2 }
  0xa5   : > { %778 = vmatmul.mubr.f32.gmra.mrb[2].mxu1 %v2446_v14  ;;  %1365 = vmatmul.mubr.f32.gmra.mrb[2].mxu0 %v2433_v8 }
  0xa6   : > { %783 = vmatprep.mubr.f32.mxu1 %v2327_v2  ;;  %1370 = vmatprep.mubr.f32.mxu0 %v2327_v2 }
  0xa9   : > { %786 = vmatmul.mubr.f32.gmra.mrb[4].mxu1 %v2452_v15  ;;  %1372 = vmatmul.mubr.f32.gmra.mrb[4].mxu0 %v2437_v11 }
  0xaa   : > { %791 = vmatprep.mubr.f32.mxu1 %v2327_v2  ;;  %1377 = vmatprep.mubr.f32.mxu0 %v2327_v2 }
  0xad   : > { %794 = vmatmul.mubr.f32.gmra.mrb[6].mxu1 %v2470_v29  ;;  %1379 = vmatmul.mubr.f32.gmra.mrb[6].mxu0 %v2454_v16 }
  0xae   : > { %799 = vmatprep.mubr.f32.mxu1 %v2327_v2  ;;  %1384 = vmatprep.mubr.f32.mxu0 %v2327_v2 }
  0xb1   : > { %802 = vmatmul.mubr.f32.gmra.mrb[8].mxu1 %v2486_v39  ;;  %1386 = vmatmul.mubr.f32.gmra.mrb[8].mxu0 %v2472_v30 }
  0xb2   : > { %807 = vmatprep.mubr.f32.mxu1 %v2327_v2  ;;  %1391 = vmatprep.mubr.f32.mxu0 %v2327_v2 }
  0xb5   : > { %810 = vmatmul.mubr.f32.gmra.mrb[10].mxu1 %v2500_v50  ;;  %1393 = vmatmul.mubr.f32.gmra.mrb[10].mxu0 %v2488_v40 }
  0xb6   : > { %815 = vmatprep.mubr.f32.mxu1 %v2327_v2  ;;  %1398 = vmatprep.mubr.f32.mxu0 %v2327_v2 }
  0xb9   : > { %818 = vmatmul.mubr.f32.gmra.mrb[12].mxu1 %v2514_v60  ;;  %1400 = vmatmul.mubr.f32.gmra.mrb[12].mxu0 %v2503_v54 }
  0xba   : > { %823 = vmatprep.mubr.f32.mxu1 %v2327_v2  ;;  %1405 = vmatprep.mubr.f32.mxu0 %v2327_v2 }
  0xbd   : > { %826 = vmatmul.mubr.f32.gmra.mrb[14].mxu1 %v2527_v4  ;;  %1407 = vmatmul.mubr.f32.gmra.mrb[14].mxu0 %v2516_v61 }
  0xbe   : > { %831 = vmatprep.mubr.f32.mxu1 %v2327_v2  ;;  %1412 = vmatprep.mubr.f32.mxu0 %v2327_v2 }
  0xc1   : > { %834 = vmatmul.mubr.f32.gmra.mrb[16].mxu1 %v2542_v19  ;;  %1414 = vmatmul.mubr.f32.gmra.mrb[16].mxu0 %v2529_v5 }
  0xc2   : > { %839 = vmatprep.mubr.f32.mxu1 %v2327_v2  ;;  %1419 = vmatprep.mubr.f32.mxu0 %v2327_v2 }
  0xc5   : > { %842 = vmatmul.mubr.f32.gmra.mrb[18].mxu1 %v2551_v22  ;;  %1421 = vmatmul.mubr.f32.gmra.mrb[18].mxu0 %v2537_v10 }
  0xc6   : > { %847 = vmatprep.mubr.f32.mxu1 %v2327_v2  ;;  %1426 = vmatprep.mubr.f32.mxu0 %v2327_v2 }
  0xc9   : > { %850 = vmatmul.mubr.f32.gmra.mrb[20].mxu1 %v2568_v37  ;;  %1428 = vmatmul.mubr.f32.gmra.mrb[20].mxu0 %v2556_v28 }
  0xca   : > { %855 = vmatprep.mubr.f32.mxu1 %v2327_v2  ;;  %1433 = vmatprep.mubr.f32.mxu0 %v2327_v2 }
  0xcd   : > { %858 = vmatmul.mubr.f32.gmra.mrb[22].mxu1 %v2577_v42  ;;  %1435 = vmatmul.mubr.f32.gmra.mrb[22].mxu0 %v2563_v33 }
  0xce   : > { %863 = vmatprep.mubr.f32.mxu1 %v2327_v2  ;;  %1440 = vmatprep.mubr.f32.mxu0 %v2327_v2 }
  0xd1   : > { %866 = vmatmul.mubr.f32.gmra.mrb[24].mxu1 %v2592_v53  ;;  %1442 = vmatmul.mubr.f32.gmra.mrb[24].mxu0 %v2581_v46 }
  0xd2   : > { %871 = vmatprep.mubr.f32.mxu1 %v2327_v2  ;;  %1447 = vmatprep.mubr.f32.mxu0 %v2327_v2 }
  0xd5   : > { %874 = vmatmul.mubr.f32.gmra.mrb[26].mxu1 %v2606_v0  ;;  %1449 = vmatmul.mubr.f32.gmra.mrb[26].mxu0 %v2594_v55 }
  0xd6   : > { %879 = vmatprep.mubr.f32.mxu1 %v2327_v2  ;;  %1454 = vmatprep.mubr.f32.mxu0 %v2327_v2 }
  0xd9   : > { %882 = vmatmul.mubr.f32.gmra.mrb[28].mxu1 %v2617_v17  ;;  %1456 = vmatmul.mubr.f32.gmra.mrb[28].mxu0 %v2608_v1 }
  0xda   : > { %887 = vmatprep.mubr.f32.mxu1 %v2327_v2  ;;  %1461 = vmatprep.mubr.f32.mxu0 %v2327_v2 }
  0xdd   : > { %890 = vmatmul.mubr.f32.gmra.mrb[30].mxu1 %v2624_v23  ;;  %1463 = vmatmul.mubr.f32.gmra.mrb[30].mxu0 %v2612_v3 }
 0x174   : > { %v771_v7 = vpop.f32.mrb[0].mxu1  ;;  %v1359_v8 = vpop.f32.mrb[0].mxu0 }
 0x175   : > { %v2022_v11 = vadd.f32 %v1359_v8, %v771_v7  ;;  %v773_v13 = vpop.f32.mrb[1].mxu1  ;;  %v1361_v14 = vpop.f32.mrb[1].mxu0 }
 0x176   : > { %v2023_v15 = vadd.f32 %v1361_v14, %v773_v13 }
 0x177   : > { %1469 = vrot.lane.b32.xlu0 %v2022_v11, %s2328_s30 }
 0x178   : > { %v779_v16 = vpop.f32.mrb[2].mxu1  ;;  %v1366_v24 = vpop.f32.mrb[2].mxu0 }
 0x179   : > { %v2024_v29 = vadd.f32 %v1366_v24, %v779_v16  ;;  %v781_v30 = vpop.f32.mrb[3].mxu1  ;;  %v1368_v32 = vpop.f32.mrb[3].mxu0 }
 0x17a   : > { %v2025_v39 = vadd.f32 %v1368_v32, %v781_v30 }
 0x17b   : > { %1471 = vrot.lane.b32.xlu0 %v2023_v15, %s2328_s30  ;;  %1492 = vrot.lane.b32.xlu1 %v2024_v29, %s2329_s5 }
 0x17c   : > { %v787_v40 = vpop.f32.mrb[4].mxu1  ;;  %v1373_v50 = vpop.f32.mrb[4].mxu0 }
 0x17d   : > { %v2026_v54 = vadd.f32 %v1373_v50, %v787_v40  ;;  %v789_v60 = vpop.f32.mrb[5].mxu1  ;;  %v1375_v61 = vpop.f32.mrb[5].mxu0 }
 0x17e   : > { %v2027_v4 = vadd.f32 %v1375_v61, %v789_v60 }
 0x17f   : > { %1494 = vrot.lane.b32.xlu1 %v2025_v39, %s2329_s5  ;;  %1516 = vrot.lane.b32.xlu0 %v2026_v54, %s2330_s6 }
 0x180   : > { %v795_v5 = vpop.f32.mrb[6].mxu1  ;;  %v1380_v10 = vpop.f32.mrb[6].mxu0 }
 0x181   : > { %v2768_v19 = vadd.f32 %v1380_v10, %v795_v5  ;;  %v797_v22 = vpop.f32.mrb[7].mxu1  ;;  %v1382_v28 = vpop.f32.mrb[7].mxu0 }
 0x182   : > { %v2770_v33 = vadd.f32 %v1382_v28, %v797_v22 }
 0x183   : > { %1518 = vrot.lane.b32.xlu1 %v2027_v4, %s2330_s6 }
 0x184   : > { %v803_v36 = vpop.f32.mrb[8].mxu1  ;;  %v1387_v37 = vpop.f32.mrb[8].mxu0 }
 0x185   : > { %v2030_v38 = vadd.f32 %v1387_v37, %v803_v36  ;;  %v805_v41 = vpop.f32.mrb[9].mxu1  ;;  %v1389_v42 = vpop.f32.mrb[9].mxu0 }
 0x186   : > { %v2031_v43 = vadd.f32 %v1389_v42, %v805_v41 }
 0x187   : > { %1552 = vrot.lane.b32.xlu0 %v2030_v38, %s2329_s5 }
 0x188   : > { %v1394_v44 = vpop.f32.mrb[10].mxu0  ;;  %1554 = vrot.lane.b32.xlu1 %v2031_v43, %s2329_s5  ;;  %v811_v45 = vpop.f32.mrb[10].mxu1  ;;  %s2338_s5 = smov 2  }
 0x189   : > { %v2032_v46 = vadd.f32 %v1394_v44, %v811_v45  ;;  %v813_v47 = vpop.f32.mrb[11].mxu1  ;;  %v1396_v48 = vpop.f32.mrb[11].mxu0 }
 0x18a   : > { %v2033_v49 = vadd.f32 %v1396_v48, %v813_v47 }
 0x18b   : > { %1560 = vrot.lane.b32.xlu0 %v2032_v46, %s2331_s7 }
 0x18c   : > { %v1401_v51 = vpop.f32.mrb[12].mxu0  ;;  %1562 = vrot.lane.b32.xlu1 %v2033_v49, %s2331_s7  ;;  %v819_v52 = vpop.f32.mrb[12].mxu1  ;;  %v1473_v49 = vlaneseq }
 0x18d   : > { %v2773_v53 = vadd.f32 %v1401_v51, %v819_v52  ;;  %v821_v55 = vpop.f32.mrb[13].mxu1  ;;  %v1403_v56 = vpop.f32.mrb[13].mxu0 }
 0x18e   : > { %v2775_v57 = vadd.f32 %v1403_v56, %v821_v55  ;;  %v2791_v52 = vshrl.u32 %v1473_v49, 7  ;;  %v2793_v55 = vand.u32 127, %v1473_v49  ;;  %v1998_v56 = vld [vmem:[%s3052_s1 + $0x1] ss:$8 sm:$0x3] }
 0x190   : > { %v827_v58 = vpop.f32.mrb[14].mxu1  ;;  %v1408_v59 = vpop.f32.mrb[14].mxu0  ;;  %vm1475_vm2 = vcmp.lt.s32.totalorder %v2793_v55, 17  ;;  %vm1496_vm3 = vcmp.lt.s32.totalorder %v2793_v55, 16  ;;  %vm1520_vm4 = vcmp.lt.s32.totalorder %v2793_v55, 1  ;;  %vm1564_vm5 = vcmp.lt.s32.totalorder %v2793_v55, 15 }
 0x191   : > { %v2036_v62 = vadd.f32 %v1408_v59, %v827_v58  ;;  %v829_v63 = vpop.f32.mrb[15].mxu1  ;;  %v1410_v0 = vpop.f32.mrb[15].mxu0  ;;  %v2799_v58 = vsub.s32 0, %v2791_v52  ;;  %v2802_v59 = vsub.s32 1, %v2791_v52  ;;  %vm1590_vm6 = vcmp.lt.s32.totalorder %v2793_v55, 127 }
 0x192   : > { %v2037_v1 = vadd.f32 %v1410_v0, %v829_v63  ;;  %v1478_v63 = vld [vmem:[%s3052_s1] ss:$8 sm:$0x3]  ;;  %vm1634_vm7 = vcmp.lt.s32.totalorder %v2793_v55, 113  ;;  %vm1658_vm8 = vcmp.lt.s32.totalorder %v2793_v55, 112  ;;  %vm1712_vm9 = vcmp.lt.s32.totalorder %v2793_v55, 111 }
 0x193   : > { %1586 = vrot.lane.b32.xlu0 %v2036_v62, %s2332_s8  ;;  %vm1754_vm10 = vcmp.lt.s32.totalorder %v2791_v52, 4  ;;  %vm1787_vm11 = vcmp.ge.s32.totalorder %v2791_v52, 4 }
 0x194   : > { %v1415_v3 = vpop.f32.mrb[16].mxu0  ;;  %1588 = vrot.lane.b32.xlu1 %v2037_v1, %s2332_s8  ;;  %v835_v6 = vpop.f32.mrb[16].mxu1  ;;  %v1505_v1 = vrot.slane %v1998_v56, %v2799_v58 }
 0x195   : > { %v2038_v9 = vadd.f32 %v1415_v3, %v835_v6  ;;  %v837_v12 = vpop.f32.mrb[17].mxu1  ;;  %v1417_v17 = vpop.f32.mrb[17].mxu0  ;;  %v1509_v3 = vrot.slane %v1998_v56, %v2802_v59  ;;  %v1999_v6 = vld [vmem:[%s3052_s1 + $0x3] ss:$8 sm:$0x3] }
 0x196   : > { %v2039_v18 = vadd.f32 %v1417_v17, %v837_v12  ;;  %v1487_v12 = vrot.slane %v1478_v63, %v2802_v59 }
 0x197   : > { %1620 = vrot.lane.b32.xlu0 %v2038_v9, %s2330_s6  ;;  %v1483_v9 = vrot.slane %v1478_v63, %v2799_v58 }
 0x198   : > { %v1422_v20 = vpop.f32.mrb[18].mxu0  ;;  %1622 = vrot.lane.b32.xlu1 %v2039_v18, %s2330_s6  ;;  %v843_v21 = vpop.f32.mrb[18].mxu1 }
 0x199   : > { %v2781_v23 = vadd.f32 %v1422_v20, %v843_v21  ;;  %v845_v25 = vpop.f32.mrb[19].mxu1  ;;  %v1424_v26 = vpop.f32.mrb[19].mxu0 }
 0x19a   : > { %v2783_v27 = vadd.f32 %v1424_v26, %v845_v25 }
 0x19c   : > { %v851_v31 = vpop.f32.mrb[20].mxu1  ;;  %v1429_v34 = vpop.f32.mrb[20].mxu0 }
 0x19d   : > { %v2042_v35 = vadd.f32 %v1429_v34, %v851_v31  ;;  %v853_v7 = vpop.f32.mrb[21].mxu1  ;;  %v1431_v8 = vpop.f32.mrb[21].mxu0  ;;  %v2822_v34 = vrot.slane %v1999_v6, %v2799_v58 }
 0x19e   : > { %v2043_v11 = vadd.f32 %v1431_v8, %v853_v7 }
 0x19f   : > { %1630 = vrot.lane.b32.xlu0 %v2042_v35, %s2333_s9  ;;  %v2825_v35 = vrot.slane %v1999_v6, %v2802_v59 }
 0x1a0   : > { %v1436_v13 = vpop.f32.mrb[22].mxu0  ;;  %1632 = vrot.lane.b32.xlu1 %v2043_v11, %s2333_s9  ;;  %v859_v14 = vpop.f32.mrb[22].mxu1  ;;  %s2021_s9 = sshll.u32 %s2386_s19, 10 }
 0x1a1   : > { %v2044_v15 = vadd.f32 %v1436_v13, %v859_v14  ;;  %v861_v16 = vpop.f32.mrb[23].mxu1  ;;  %v1438_v24 = vpop.f32.mrb[23].mxu0  ;;  %s3004_s12 = scalar_lea.hbm %s3055_s4, %s2021_s9 }
 0x1a2   : > { %v2045_v29 = vadd.f32 %v1438_v24, %v861_v16 }
 0x1a3   : > { %1654 = vrot.lane.b32.xlu0 %v2044_v15, %s2334_s10 }
 0x1a4   : > { %v1443_v30 = vpop.f32.mrb[24].mxu0  ;;  %1656 = vrot.lane.b32.xlu1 %v2045_v29, %s2334_s10  ;;  %v867_v32 = vpop.f32.mrb[24].mxu1 }
 0x1a5   : > { %v2785_v39 = vadd.f32 %v1443_v30, %v867_v32  ;;  %v869_v40 = vpop.f32.mrb[25].mxu1  ;;  %v1445_v50 = vpop.f32.mrb[25].mxu0 }
 0x1a6   : > { %v2787_v54 = vadd.f32 %v1445_v50, %v869_v40 }
 0x1a8   : > { %v875_v60 = vpop.f32.mrb[26].mxu1  ;;  %v1450_v61 = vpop.f32.mrb[26].mxu0 }
 0x1a9   : > { %v2048_v4 = vadd.f32 %v1450_v61, %v875_v60  ;;  %v877_v5 = vpop.f32.mrb[27].mxu1  ;;  %v1452_v10 = vpop.f32.mrb[27].mxu0  ;;  %v2000_v60 = vld [vmem:[%s3052_s1 + $0x2] ss:$8 sm:$0x3] }
 0x1aa   : > { %v2049_v22 = vadd.f32 %v1452_v10, %v877_v5  ;;  %v1573_v10 = vrot.slane %v2000_v60, %v2799_v58 }
 0x1ab   : > { %1688 = vrot.lane.b32.xlu0 %v2048_v4, %s2332_s8 }
 0x1ac   : > { %v1457_v28 = vpop.f32.mrb[28].mxu0  ;;  %1690 = vrot.lane.b32.xlu1 %v2049_v22, %s2332_s8  ;;  %v883_v36 = vpop.f32.mrb[28].mxu1  ;;  %v1577_v22 = vrot.slane %v2000_v60, %v2802_v59 }
 0x1ad   : > { %v2050_v37 = vadd.f32 %v1457_v28, %v883_v36  ;;  %v885_v38 = vpop.f32.mrb[29].mxu1  ;;  %v1459_v41 = vpop.f32.mrb[29].mxu0 }
 0x1ae   : > { %v2051_v42 = vadd.f32 %v1459_v41, %v885_v38 }
 0x1af   : > { %1698 = vrot.lane.b32.xlu0 %v2050_v37, %s2334_s10 }
 0x1b0   : > { %v1464_v43 = vpop.f32.mrb[30].mxu0  ;;  %1700 = vrot.lane.b32.xlu1 %v2051_v42, %s2334_s10  ;;  %v891_v44 = vpop.f32.mrb[30].mxu1 }
 0x1b1   : > { %v2052_v45 = vadd.f32 %v1464_v43, %v891_v44  ;;  %v893_v46 = vpop.f32.mrb[31].mxu1  ;;  %v1466_v47 = vpop.f32.mrb[31].mxu0 }
 0x1b2   : > { %v2053_v48 = vadd.f32 %v1466_v47, %v893_v46  ;;  %v2001_v47 = vld [vmem:[%s3052_s1 + $0x5] ss:$8 sm:$0x3] }
 0x1b3   : > { %1708 = vrot.lane.b32.xlu0 %v2052_v45, %s2335_s11  ;;  %v1603_v63 = vrot.slane %v2001_v47, %v2802_v59 }
 0x1b4   : > { %1710 = vrot.lane.b32.xlu1 %v2053_v48, %s2335_s11 }
 0x1e9   : > { %v1470_v51 = vpop.permute.xlu0 %1469 }
 0x1ed   : > { %v1493_v62 = vpop.permute.xlu1 %1492  ;;  %v1472_v0 = vpop.permute.xlu0 %1471 }
 0x1ee   : > { %v1476_v18 = vsel %vm1475_vm2, %v1470_v51, %v1472_v0  ;;  %v1477_v20 = vsel %vm1475_vm2, %v1472_v0, %v1470_v51 }
 0x1ef   : > { %v1490_v7 = vmul.f32 %v1483_v9, %v1477_v20  ;;  %v1491_v8 = vmul.f32 %v1487_v12, %v1476_v18 }
 0x1f1   : > { %v1495_v17 = vpop.permute.xlu1 %1494  ;;  %v1517_v11 = vpop.permute.xlu0 %1516 }
 0x1f2   : > { %v1497_v21 = vsel %vm1496_vm3, %v1493_v62, %v1495_v17  ;;  %v1498_v25 = vsel %vm1496_vm3, %v1495_v17, %v1493_v62  ;;  %v1599_v62 = vrot.slane %v2001_v47, %v2799_v58 }
 0x1f3   : > { %v1512_v26 = vmul.f32 %v1505_v1, %v1498_v25  ;;  %v1513_v31 = vmul.f32 %v1509_v3, %v1497_v21 }
 0x1f5   : > { %v1519_v13 = vpop.permute.xlu1 %1518  ;;  %v1514_v16 = vadd.f32 %v1512_v26, %v1490_v7  ;;  %v1515_v24 = vadd.f32 %v1513_v31, %v1491_v8 }
 0x1f6   : > { %v1521_v14 = vsel %vm1520_vm4, %v1517_v11, %v1519_v13  ;;  %v1522_v15 = vsel %vm1520_vm4, %v1519_v13, %v1517_v11 }
 0x1f7   : > { %v1536_v29 = vmul.f32 %v2822_v34, %v1522_v15  ;;  %v1537_v30 = vmul.f32 %v2825_v35, %v1521_v14 }
 0x1f9   : > { %v1538_v32 = vadd.f32 %v1536_v29, %v1514_v16  ;;  %v1539_v40 = vadd.f32 %v1537_v30, %v1515_v24  ;;  %v1553_v50 = vpop.permute.xlu0 %1552  ;;  %v2003_v24 = vld [vmem:[%s3052_s1 + $0x7] ss:$8 sm:$0x3] }
 0x1fa   : > { %v1555_v61 = vpop.permute.xlu1 %1554 }
 0x1fb   : > { %v2837_v4 = vadd.f32 %v2768_v19, %v1538_v32  ;;  %v2840_v5 = vadd.f32 %v2770_v33, %v1539_v40  ;;  %v1556_v33 = vsel %vm1496_vm3, %v1553_v50, %v1555_v61  ;;  %v1557_v41 = vsel %vm1496_vm3, %v1555_v61, %v1553_v50 }
 0x1fc   : > { %v1558_v48 = vmul.f32 %v1557_v41, %v1505_v1  ;;  %v1559_v49 = vmul.f32 %v1556_v33, %v1509_v3 }
 0x1fd   : > { %v1561_v28 = vpop.permute.xlu0 %1560  ;;  %v1542_v36 = vadd.f32 %v2840_v5, %v2837_v4  ;;  %v1546_v37 = vmul.f32 %v2837_v4, %v2837_v4  ;;  %v1547_v19 = vmul.f32 %v2840_v5, %v2840_v5 }
 0x1fe   : > { %v1563_v38 = vpop.permute.xlu1 %1562 }
 0x1ff   : > { %v1565_v42 = vsel %vm1564_vm5, %v1561_v28, %v1563_v38  ;;  %v1566_v43 = vsel %vm1564_vm5, %v1563_v38, %v1561_v28  ;;  %1543 = vadd.xlane.f32.xlu0 %v1542_v36  ;;  %v1548_v46 = vadd.f32 %v1547_v19, %v1546_v37 }
 0x200   : > { %v1580_v44 = vmul.f32 %v1573_v10, %v1566_v43  ;;  %v1581_v45 = vmul.f32 %v1577_v22, %v1565_v42  ;;  %v1667_v10 = vrot.slane %v2003_v24, %v2799_v58  ;;  %v1671_v22 = vrot.slane %v2003_v24, %v2802_v59 }
 0x202   : > { %v1582_v51 = vadd.f32 %v1580_v44, %v1558_v48  ;;  %v1583_v56 = vadd.f32 %v1581_v45, %v1559_v49 }
 0x203   : > { %1549 = vadd.xlane.f32.xlu0 %v1548_v46 }
 0x204   : > { %v1584_v1 = vadd.f32 %v2773_v53, %v1582_v51  ;;  %v1585_v3 = vadd.f32 %v2775_v57, %v1583_v56  ;;  %v2002_v53 = vld [vmem:[%s3052_s1 + $0x6] ss:$8 sm:$0x3] }
 0x205   : > { %v1587_v0 = vpop.permute.xlu0 %1586  ;;  %v1643_v14 = vrot.slane %v2002_v53, %v2799_v58  ;;  %v1647_v15 = vrot.slane %v2002_v53, %v2802_v59 }
 0x206   : > { %v1589_v6 = vpop.permute.xlu1 %1588 }
 0x207   : > { %v1591_v9 = vsel %vm1590_vm6, %v1587_v0, %v1589_v6  ;;  %v1592_v12 = vsel %vm1590_vm6, %v1589_v6, %v1587_v0  ;;  %v2004_v0 = vld [vmem:[%s3052_s1 + $0x10] ss:$8 sm:$0x3] }
 0x208   : > { %v1606_v17 = vmul.f32 %v1599_v62, %v1591_v9  ;;  %v1607_v18 = vmul.f32 %v1603_v63, %v1592_v12 }
 0x209   : > { %v1621_v25 = vpop.permute.xlu0 %1620 }
 0x20a   : > { %v2867_v20 = vadd.f32 %v1606_v17, %v1584_v1  ;;  %v2869_v21 = vadd.f32 %v1607_v18, %v1585_v3  ;;  %v1623_v26 = vpop.permute.xlu1 %1622 }
 0x20b   : > { %v1624_v57 = vsel %vm1520_vm4, %v1621_v25, %v1623_v26  ;;  %v1625_v11 = vsel %vm1520_vm4, %v1623_v26, %v1621_v25  ;;  %v1721_v25 = vrot.slane %v2004_v0, %v2799_v58  ;;  %v1725_v26 = vrot.slane %v2004_v0, %v2802_v59 }
 0x20c   : > { %v1610_v31 = vadd.f32 %v2869_v21, %v2867_v20  ;;  %v1614_v7 = vmul.f32 %v2867_v20, %v2867_v20  ;;  %v1615_v8 = vmul.f32 %v2869_v21, %v2869_v21  ;;  %v1626_v29 = vmul.f32 %v1625_v11, %v2822_v34 }
 0x20d   : > { %v1627_v30 = vmul.f32 %v1624_v57, %v2825_v35 }
 0x20e   : > { %1611 = vadd.xlane.f32.xlu1 %v1610_v31  ;;  %v1616_v13 = vadd.f32 %v1615_v8, %v1614_v7  ;;  %v1628_v36 = vadd.f32 %v2781_v23, %v1626_v29 }
 0x20f   : > { %v1629_v37 = vadd.f32 %v2783_v27, %v1627_v30 }
 0x210   : > { %1617 = vadd.xlane.f32.xlu0 %v1616_v13 }
 0x211   : > { %v1631_v16 = vpop.permute.xlu0 %1630 }
 0x212   : > { %v1633_v32 = vpop.permute.xlu1 %1632 }
 0x213   : > { %v1635_v40 = vsel %vm1634_vm7, %v1631_v16, %v1633_v32  ;;  %v1636_v50 = vsel %vm1634_vm7, %v1633_v32, %v1631_v16  ;;  %v2940_v32 = vld [vmem:[%s3054_s3] sm:$0xff] }
 0x214   : > { %v1650_v60 = vmul.f32 %v1643_v14, %v1635_v40  ;;  %v1651_v61 = vmul.f32 %v1647_v15, %v1636_v50 }
 0x215   : > { %v1655_v28 = vpop.permute.xlu0 %1654 }
 0x216   : > { %v1657_v19 = vpop.permute.xlu1 %1656  ;;  %v1652_v38 = vadd.f32 %v1650_v60, %v1628_v36  ;;  %v1653_v33 = vadd.f32 %v1651_v61, %v1629_v37  ;;  %v1743_v61 = vmul.f32 1024.0, %v2940_v32  ;;  %v1748_v36 = vmul.f32 %v2940_v32, %v2940_v32 }
 0x217   : > { %v1659_v34 = vsel %vm1658_vm8, %v1655_v28, %v1657_v19  ;;  %v1660_v35 = vsel %vm1658_vm8, %v1657_v19, %v1655_v28 }
 0x218   : > { %v1674_v41 = vmul.f32 %v1667_v10, %v1659_v34  ;;  %v1675_v42 = vmul.f32 %v1671_v22, %v1660_v35 }
 0x21a   : > { %v2901_v43 = vadd.f32 %v1674_v41, %v1652_v38  ;;  %v2903_v44 = vadd.f32 %v1675_v42, %v1653_v33  ;;  %v2005_v38 = vsel %vm1754_vm10, 1.0, %v2327_v2 }
 0x21c   : > { %v1678_v23 = vadd.f32 %v2903_v44, %v2901_v43  ;;  %v1682_v27 = vmul.f32 %v2901_v43, %v2901_v43  ;;  %v1683_v45 = vmul.f32 %v2903_v44, %v2903_v44 }
 0x21d   : > { %v1689_v46 = vpop.permute.xlu0 %1688 }
 0x21e   : > { %v1691_v47 = vpop.permute.xlu1 %1690  ;;  %1679 = vadd.xlane.f32.xlu1 %v1678_v23  ;;  %v1684_v48 = vadd.f32 %v1683_v45, %v1682_v27  ;;  %v1749_v23 = vmul.f32 1024.0, %v1748_v36  ;;  %v2006_v27 = vsel %vm1787_vm11, 1.0, %v2327_v2 }
 0x21f   : > { %v1692_v49 = vsel %vm1590_vm6, %v1689_v46, %v1691_v47  ;;  %v1693_v51 = vsel %vm1590_vm6, %v1691_v47, %v1689_v46 }
 0x220   : > { %1685 = vadd.xlane.f32.xlu0 %v1684_v48  ;;  %v1694_v6 = vmul.f32 %v1692_v49, %v1599_v62  ;;  %v1695_v9 = vmul.f32 %v1693_v51, %v1603_v63 }
 0x221   : > { %v1699_v56 = vpop.permute.xlu0 %1698 }
 0x222   : > { %v1701_v12 = vpop.permute.xlu1 %1700  ;;  %v1696_v7 = vadd.f32 %v2785_v39, %v1694_v6  ;;  %v1697_v62 = vadd.f32 %v2787_v54, %v1695_v9 }
 0x223   : > { %v1702_v1 = vsel %vm1658_vm8, %v1699_v56, %v1701_v12  ;;  %v1703_v3 = vsel %vm1658_vm8, %v1701_v12, %v1699_v56  ;;  %v2336_v12 = vmov 1  }
 0x224   : > { %v1704_v17 = vmul.f32 %v1702_v1, %v1667_v10  ;;  %v1705_v18 = vmul.f32 %v1703_v3, %v1671_v22  ;;  %v1745_v10 = vmul.f32 2.0, %v2940_v32  ;;  %2241 = vset.pattern.permute.xlu1 %v2336_v12 }
 0x225   : > { %v1709_v31 = vpop.permute.xlu0 %1708 }
 0x226   : > { %v1711_v63 = vpop.permute.xlu1 %1710  ;;  %v1706_v57 = vadd.f32 %v1704_v17, %v1696_v7  ;;  %v1707_v11 = vadd.f32 %v1705_v18, %v1697_v62 }
 0x227   : > { %v1713_v8 = vsel %vm1712_vm9, %v1709_v31, %v1711_v63  ;;  %v1714_v53 = vsel %vm1712_vm9, %v1711_v63, %v1709_v31 }
 0x228   : > { %v1728_v13 = vmul.f32 %v1721_v25, %v1713_v8  ;;  %v1729_v14 = vmul.f32 %v1725_v26, %v1714_v53 }
 0x22a   : > { %v2927_v15 = vadd.f32 %v1728_v13, %v1706_v57  ;;  %v2929_v55 = vadd.f32 %v1729_v14, %v1707_v11 }
 0x22c   : > { %v1732_v58 = vadd.f32 %v2929_v55, %v2927_v15  ;;  %v1736_v59 = vmul.f32 %v2927_v15, %v2927_v15  ;;  %v1737_v39 = vmul.f32 %v2929_v55, %v2929_v55 }
 0x22e   : > { %1733 = vadd.xlane.f32.xlu1 %v1732_v58  ;;  %v1738_v54 = vadd.f32 %v1737_v39, %v1736_v59 }
 0x230   : > { %1739 = vadd.xlane.f32.xlu0 %v1738_v54 }
 0x28c   : > { %v1544_v16 = vpop.xlane.xlu0 %1543 }
 0x290   : > { %v1550_v24 = vpop.xlane.xlu0 %1549 }
 0x29b   : > { %v1612_v29 = vpop.xlane.xlu1 %1611 }
 0x29c   : > { %v1613_v50 = vadd.f32 %v1612_v29, %v1544_v16 }
 0x29d   : > { %v1618_v30 = vpop.xlane.xlu0 %1617 }
 0x29e   : > { %v1619_v22 = vadd.f32 %v1618_v30, %v1550_v24 }
 0x2ab   : > { %v1680_v40 = vpop.xlane.xlu1 %1679 }
 0x2ac   : > { %v1681_v28 = vadd.f32 %v1680_v40, %v1613_v50 }
 0x2ad   : > { %v1686_v60 = vpop.xlane.xlu0 %1685 }
 0x2ae   : > { %v1687_v19 = vadd.f32 %v1686_v60, %v1619_v22 }
 0x2bb   : > { %v1734_v37 = vpop.xlane.xlu1 %1733 }
 0x2bc   : > { %v1735_v34 = vadd.f32 %v1734_v37, %v1681_v28 }
 0x2bd   : > { %v1740_v35 = vpop.xlane.xlu0 %1739 }
 0x2be   : > { %v1744_v33 = vadd.f32 %v1743_v61, %v1735_v34  ;;  %v1746_v41 = vmul.f32 %v1745_v10, %v1735_v34  ;;  %v1741_v42 = vadd.f32 %v1740_v35, %v1687_v19 }
 0x2c0   : > { %v1747_v45 = vadd.f32 %v1746_v41, %v1741_v42  ;;  %v1758_v46 = vmul.f32 %v2005_v38, %v1744_v33  ;;  %v1792_v49 = vmul.f32 %v2006_v27, %v1744_v33 }
 0x2c2   : > { %v1760_v47 = vsel %vm1759_vm12, %v1758_v46, 0.0  ;;  %v1750_v48 = vadd.f32 %v1749_v23, %v1747_v45  ;;  %v1793_v0 = vsel %vm1759_vm12, %v1792_v49, 0.0  ;;  %v2337_v23 = vmov 2  }
 0x2c3   : > { %1761 = vadd.xlane.f32.xlu1 %v1760_v47  ;;  %2243 = vset.pattern.permute.xlu0 %v2337_v23 }
 0x2c4   : > { %v1771_v51 = vmul.f32 %v2005_v38, %v1750_v48  ;;  %v1804_v6 = vmul.f32 %v2006_v27, %v1750_v48 }
 0x2c6   : > { %v1772_v56 = vsel %vm1759_vm12, %v1771_v51, 0.0  ;;  %v1805_v9 = vsel %vm1759_vm12, %v1804_v6, 0.0 }
 0x2c7   : > { %1773 = vadd.xlane.f32.xlu0 %v1772_v56  ;;  %1794 = vadd.xlane.f32.xlu1 %v1793_v0 }
 0x2cb   : > { %1806 = vadd.xlane.f32.xlu0 %v1805_v9 }
 0x350   : > { %v1762_v1 = vpop.xlane.xlu1 %1761 }
 0x351   : > { %v1763_v3 = vrot.slane %v1762_v1, 4 }
 0x353   : > { %v1764_v17 = vadd.f32 %v1763_v3, %v1762_v1 }
 0x354   : > { %v1774_v2 = vpop.xlane.xlu0 %1773  ;;  %v1795_v18 = vpop.xlane.xlu1 %1794 }
 0x355   : > { %v1765_v25 = vrot.slane %v1764_v17, 2  ;;  %v1775_v26 = vrot.slane %v1774_v2, 4  ;;  %v1796_v31 = vrot.slane %v1795_v18, 4 }
 0x357   : > { %v1776_v7 = vadd.f32 %v1775_v26, %v1774_v2  ;;  %v1797_v62 = vadd.f32 %v1796_v31, %v1795_v18  ;;  %v1766_v63 = vadd.f32 %v1765_v25, %v1764_v17 }
 0x358   : > { %v1807_v8 = vpop.xlane.xlu0 %1806 }
 0x359   : > { %v1777_v53 = vrot.slane %v1776_v7, 2  ;;  %v1798_v57 = vrot.slane %v1797_v62, 2  ;;  %v1808_v11 = vrot.slane %v1807_v8, 4  ;;  %v1767_v13 = vrot.slane %v1766_v63, 1 }
 0x35b   : > { %v1809_v14 = vadd.f32 %v1808_v11, %v1807_v8  ;;  %v1768_v58 = vadd.f32 %v1767_v13, %v1766_v63  ;;  %v1778_v59 = vadd.f32 %v1777_v53, %v1776_v7  ;;  %v1799_v39 = vadd.f32 %v1798_v57, %v1797_v62 }
 0x35d   : > { %v1810_v54 = vrot.slane %v1809_v14, 2  ;;  %2182 = vpush %v1768_v58  ;;  %v1779_v16 = vrot.slane %v1778_v59, 1  ;;  %v1800_v24 = vrot.slane %v1799_v39, 1 }
 0x35f   : > { %v1780_v29 = vadd.f32 %v1779_v16, %v1778_v59  ;;  %v1801_v30 = vadd.f32 %v1800_v24, %v1799_v39  ;;  %v1811_v40 = vadd.f32 %v1810_v54, %v1809_v14 }
 0x361   : > { %2184 = vpush %v1780_v29  ;;  %v1812_v50 = vrot.slane %v1811_v40, 1 }
 0x362   : > { %2186 = vpush %v1801_v30 }
 0x363   : > { %v1813_v60 = vadd.f32 %v1812_v50, %v1811_v40 }
 0x365   : > { %2188 = vpush %v1813_v60 }
 0x38e   : > { %s2183_s14 = spop %2182 }
 0x38f   : > { %s1770_s20 = smul.f32 0.00024414063, %s2183_s14 }
 0x391   : > { %v1783_v61 = vstv %s1770_s20  ;;  %s2339_s20 = smov [#allocation2]  }
 0x392   : > { %s2185_s22 = spop %2184  ;;  %v1784_v10 = vsel %vm1754_vm10, %v1783_v61, 0.0 }
 0x393   : > { %s1782_s23 = smul.f32 0.00024414063, %s2185_s22  ;;  %s2187_s27 = spop %2186 }
 0x394   : > { %s1803_s28 = smul.f32 0.00024414063, %s2187_s27  ;;  %s2267_s22 = sshll.u32 %s2339_s20, 4  ;;  %s2268_s22 = int_to_ptr.vmem [resolvable:$false] %s2267_s22 }
 0x395   : > { %v1785_v22 = vstv %s1782_s23  ;;  %s2269_s23 = scalar_lea.vmem %s2268_s22, 2048 }
 0x396   : > { %v1816_v28 = vstv %s1803_s28  ;;  %s2189_s29 = spop %2188  ;;  %v1786_v37 = vsel %vm1754_vm10, %v1785_v22, 0.0 }
 0x397   : > { %v1817_v36 = vsel %vm1787_vm11, %v1816_v28, %v1784_v10  ;;  %s1815_s30 = smul.f32 0.00024414063, %s2189_s29 }
 0x398   : > { %v1820_v19 = vmul.f32 %v1817_v36, %v1817_v36  ;;  %v1825_v27 = vsub.f32 %v2940_v32, %v1817_v36 }
 0x399   : > { %v1818_v34 = vstv %s1815_s30 }
 0x39a   : > { %v1819_v35 = vsel %vm1787_vm11, %v1818_v34, %v1786_v37 }
 0x39b   : > { %v1821_v38 = vsub.f32 %v1819_v35, %v1820_v19 }
 0x39d   : > { %v1822_v33 = vadd.f32 1e-05, %v1821_v38 }
 0x39f   : > { %2245 = vrsqrt.f32 %v1822_v33 }
 0x3a9   : > { %v2246_v41 = vpop.eup %2245 }
 0x3aa   : > { %v1824_v42 = vmul.f32 %v2246_v41, %v2940_v32 }
 0x3ac   : > { %1827 = vrot.lane.b32.xlu1 %v1824_v42, %s2332_s8  ;;  %s188_s8 = sand.u32 1, %s2317_s16  }
 0x3ad   : > { %s1995_s6 = sshll.u32 %s188_s8, 6  ;;  %s1918_s13 = scalar_lea.sflag [#allocation3], %s188_s8 }
 0x3ae   : > { %s2986_s7 = scalar_lea.vmem [#allocation2], %s1995_s6 }
 0x3af   : > { %s1932_s10 = sshll.u32 %s2986_s7, 4  ;;  %s3006_s10 = int_to_ptr.vmem [resolvable:$true] %s1932_s10 }
 0x3b0   : > { %1837 = vperm.xlu1 %2241, %v1824_v42   ;;  %s2263_s14 = scalar_lea.vmem %s3006_s10, 1024  ;;  %p2270_p0 = scmp.lt.s32.totalorder %s3006_s10, %s2268_s22 }
 0x3b1   : > { %p2264_p11 = scmp.ne.s32.totalorder %s3006_s10, %s2263_s14  ;;  %p2271_p1 = scmp.lt.s32.totalorder %s2269_s23, %s2263_s14 }
 0x3b3   : > { %p2265_p12 = pnand %p2264_p11, %p2403_p5  ;;  %p2272_p2 = por %p2271_p1, %p2270_p0 }
 0x3b4   : > { %2242 = vset.pattern.permute.xlu1 %v2337_v23 }
 0x3b5   : > { %p2266_p13 = pneg %p2265_p12 }
 0x3b7   : > { %p2273_p3 = pnand %p2272_p2, %p2266_p13 }
 0x41e   : > { %v1828_v45 = vpop.permute.xlu1 %1827 }
 0x41f   : > { %v1830_v46 = vmul.f32 %v1828_v45, %v1825_v27 }
 0x421   : > { %1832 = vrot.lane.b32.xlu0 %v1830_v46, %s2338_s5 }
 0x42f   : > { %v1838_v48 = vpop.permute.xlu1 %1837 }
 0x430   : > { %v1840_v49 = vmul.f32 %v1838_v48, %v2837_v4  ;;  %v1841_v51 = vmul.f32 %v1838_v48, %v2840_v5  ;;  %v1863_v56 = vmul.f32 %v1838_v48, %v2867_v20  ;;  %v1864_v0 = vmul.f32 %v1838_v48, %v2869_v21 }
 0x431   : > { %v1881_v6 = vmul.f32 %v1838_v48, %v2901_v43  ;;  %v1882_v9 = vmul.f32 %v1838_v48, %v2903_v44  ;;  %v1899_v12 = vmul.f32 %v1838_v48, %v2927_v15  ;;  %v1900_v18 = vmul.f32 %v1838_v48, %v2929_v55 }
 0x493   : > { %v1833_v52 = vpop.permute.xlu0 %1832 }
 0x494   : > { %v1835_v47 = vadd.f32 %v1833_v52, %v2940_v32 }
 0x496   : > { %1844 = vperm.xlu1 %2242, %v1835_v47  }
 0x515   : > { %v1845_v1 = vpop.permute.xlu1 %1844 }
 0x516   : > { %v1847_v3 = vadd.f32 %v1845_v1, %v1840_v49  ;;  %v1848_v17 = vadd.f32 %v1845_v1, %v1841_v51  ;;  %v1865_v32 = vadd.f32 %v1863_v56, %v1845_v1  ;;  %v1866_v2 = vadd.f32 %v1864_v0, %v1845_v1 }
 0x517   : > { %v1883_v4 = vadd.f32 %v1881_v6, %v1845_v1  ;;  %v2974_v25 = vadd.f32 %v1882_v9, %v1845_v1  ;;  %v2976_v26 = vadd.f32 %v1899_v12, %v1845_v1  ;;  %v2978_v31 = vadd.f32 %v1900_v18, %v1845_v1 }
 0x518   : > { %v1851_v5 = vmin.f32 %v1847_v3, 0.0  ;;  %v1852_v20 = vmin.f32 %v1848_v17, 0.0  ;;  %v1869_v21 = vmin.f32 %v1865_v32, 0.0  ;;  %v1870_v43 = vmin.f32 %v1866_v2, 0.0 }
 0x519   : > { %v1887_v63 = vmin.f32 %v1883_v4, 0.0  ;;  %v1888_v8 = vmin.f32 %v2974_v25, 0.0  ;;  %v1905_v55 = vmin.f32 %v2976_v26, 0.0  ;;  %v1906_v11 = vmin.f32 %v2978_v31, 0.0 }
 0x51a   : > { %v1853_v44 = vmul.f32 1.442695, %v1851_v5  ;;  %v1855_v15 = vmul.f32 1.442695, %v1852_v20  ;;  %v1871_v7 = vmul.f32 1.442695, %v1869_v21 }
 0x51b   : > { %v1873_v62 = vmul.f32 1.442695, %v1870_v43  ;;  %v1889_v53 = vmul.f32 1.442695, %v1887_v63  ;;  %v1891_v57 = vmul.f32 1.442695, %v1888_v8 }
 0x51c   : > { %2247 = vpow2.f32 %v1853_v44  ;;  %v1907_v13 = vmul.f32 1.442695, %v1905_v55  ;;  %v1909_v14 = vmul.f32 1.442695, %v1906_v11  ;;  %vm1849_vm13 = vcmp.gt.f32.partialorder %v1847_v3, 0.0 }
 0x51d   : > { %2249 = vpow2.f32 %v1855_v15  ;;  %vm1850_vm14 = vcmp.gt.f32.partialorder %v1848_v17, 0.0  ;;  %vm1867_vm15 = vcmp.gt.f32.partialorder %v1865_v32, 0.0  ;;  %vm1868_vm0 = vcmp.gt.f32.partialorder %v1866_v2, 0.0 }
 0x51e   : > { %2251 = vpow2.f32 %v1871_v7  ;;  %vm1885_vm1 = vcmp.gt.f32.partialorder %v1883_v4, 0.0  ;;  %vm1886_vm2 = vcmp.gt.f32.partialorder %v2974_v25, 0.0  ;;  %vm1903_vm3 = vcmp.gt.f32.partialorder %v2976_v26, 0.0 }
 0x51f   : > { %2253 = vpow2.f32 %v1873_v62  ;;  %vm1904_vm4 = vcmp.gt.f32.partialorder %v2978_v31, 0.0 }
 0x520   : > { %2255 = vpow2.f32 %v1889_v53 }
 0x521   : > { %2257 = vpow2.f32 %v1891_v57 }
 0x522   : > { %2259 = vpow2.f32 %v1907_v13 }
 0x523   : > { %2261 = vpow2.f32 %v1909_v14 }
 0x526   : > { %v2248_v58 = vpop.eup %2247 }
 0x527   : > { %v2250_v59 = vpop.eup %2249  ;;  %v2007_v39 = vadd.f32 -1.0, %v2248_v58 }
 0x528   : > { %v2252_v54 = vpop.eup %2251  ;;  %v2008_v16 = vadd.f32 -1.0, %v2250_v59 }
 0x529   : > { %v2254_v24 = vpop.eup %2253  ;;  %v1859_v29 = vsel %vm1849_vm13, %v1847_v3, %v2007_v39  ;;  %v2009_v30 = vadd.f32 -1.0, %v2252_v54 }
 0x52a   : > { %v2256_v40 = vpop.eup %2255  ;;  %v1860_v50 = vsel %vm1850_vm14, %v1848_v17, %v2008_v16  ;;  %1861 = vst [vmem:[%s2986_s7] sm:$0xff] %v1859_v29  ;;  %v2010_v60 = vadd.f32 -1.0, %v2254_v24 }
 0x52b   : > { %v2258_v61 = vpop.eup %2257  ;;  %1862 = vst [vmem:[%s2986_s7 + $0x8] sm:$0xff] %v1860_v50  ;;  %v1877_v10 = vsel %vm1867_vm15, %v1865_v32, %v2009_v30  ;;  %v2011_v22 = vadd.f32 -1.0, %v2256_v40 }
 0x52c   : > { %v2260_v28 = vpop.eup %2259  ;;  %v1878_v36 = vsel %vm1868_vm0, %v1866_v2, %v2010_v60  ;;  %1879 = vst [vmem:[%s2986_s7 + $0x10] sm:$0xff] %v1877_v10  ;;  %v2012_v37 = vadd.f32 -1.0, %v2258_v61 }
 0x52d   : > { %v2262_v19 = vpop.eup %2261  ;;  %1880 = vst [vmem:[%s2986_s7 + $0x18] sm:$0xff] %v1878_v36  ;;  %v1895_v34 = vsel %vm1885_vm1, %v1883_v4, %v2011_v22  ;;  %v2013_v35 = vadd.f32 -1.0, %v2260_v28 }
 0x52e   : > { %v1896_v38 = vsel %vm1886_vm2, %v2974_v25, %v2012_v37  ;;  %1897 = vst [vmem:[%s2986_s7 + $0x20] sm:$0xff] %v1895_v34  ;;  %v2014_v33 = vadd.f32 -1.0, %v2262_v19 }
 0x52f   : > { %1898 = vst [vmem:[%s2986_s7 + $0x28] sm:$0xff] %v1896_v38  ;;  %v1913_v41 = vsel %vm1903_vm3, %v2976_v26, %v2013_v35 }
 0x530   : > { %v1914_v42 = vsel %vm1904_vm4, %v2978_v31, %v2014_v33  ;;  %1915 = vst [vmem:[%s2986_s7 + $0x30] sm:$0xff] %v1913_v41 }
 0x531   : > { %1916 = vst [vmem:[%s2986_s7 + $0x38] sm:$0xff] %v1914_v42 }
 0x532   : > { %2276 = shalt.err (!%p2273_p3)
}
 0x533   : > { %s2277_s27 = scalar_lea.hbm %s3004_s12, 1024  ;;  %s2281_s30 = scalar_lea.hbm %s3055_s4, 2048 }
 0x534   : > { %p2278_p4 = scmp.ne.s32.totalorder %s3004_s12, %s2277_s27  ;;  %p2282_p9 = scmp.lt.u32.totalorder %s3004_s12, %s3055_s4 }
 0x535   : > { %p2283_p10 = scmp.lt.u32.totalorder %s2281_s30, %s2277_s27  ;;  %p2285_p12 = scmp.lt.u32.totalorder %s2277_s27, %s3004_s12 }
 0x536   : > { %p2279_p7 = pnand %p2278_p4, %p2403_p5 }
 0x537   : > { %p2284_p11 = por %p2283_p10, %p2282_p9 }
 0x538   : > { %p2280_p8 = pneg %p2279_p7 }
 0x539   : > { %p2286_p13 = por %p2285_p12, %p2284_p11 }
 0x53b   : > { %p2287_p0 = pnand %p2286_p13, %p2280_p8 }
 0x53d   : > { %2290 = shalt.err (!%p2287_p0)
}
 0x53e   : > { %2190 = dma.vmem_to_hbm [thread:$0]  (%p2403_p5), %s3006_s10, 1024, %s3004_s12, %s1918_s13  }
 0x53f PF: > { %p2196_p1 = scmp.ge.s32.totalorder %s2325_s18, 2  ;;  %s1944_s6 = sand.u32 1, %s2313_s15  }
 0x540   : > { %s1945_s7 = scalar_lea.sflag [#allocation3], %s1944_s6 }
 0x541   : > { %p2193_p2 = pnand %p2196_p1, %p2407_p6 }
 0x543   : > { %2308 = dma.done.wait (!%p2193_p2), %s1945_s7, 1024  }
 0x544   : > { %2310 = vsyncadd (!%p2193_p2), %s1945_s7, 4294966272  ;;  %p14_p3 = scmp.ge.s32.totalorder %s2390_s21, 4   ;;  %s3058_s15 = smov %s2317_s16 }
 0x545   : > { %s3059_s16 = smov %s2321_s17  ;;  %s3060_s17 = smov %s2401_s24 }
 0x546   : > { %s3061_s18 = smov %s2390_s21  ;;  %16 = sbr.rel (!%p14_p3) target bundleno = 3 (0x3), region = 78 }
 0x54d   :  { %1950 = vsyncpa [#allocation3], 1 }
 0x54e   :  { %1952 = vsyncpa [#allocation3 + $0x1], 1 }

</bundles_post_ra>
